<compile_context>
chip_gen: v7x
topology: tpu7x:2x2x1
jax: 0.10.0
libtpu: 0.0.40
codegen_flags: <defaults>
</compile_context>

<pallas_src>
import functools

import jax
import jax.numpy as jnp
import numpy as np
from jax import lax
from jax.experimental import pallas as pl
from jax.experimental.pallas import tpu as pltpu


def _conv_bn_relu_kernel(x_ref, w_ref, scale_ref, bias_ref, o_ref, *scratch,
                         K, rate, W, TH, n_strips, n_cin_tiles):
    """One grid step: one (batch, Cout-tile, Cin-tile) of the fused conv+BN+ReLU.

    x_ref:     (1, Hp, Wp, TCin)   zero-padded bf16 input slab
    w_ref:     (K, K, TCin, TCout) bf16 weight tile
    scale_ref: (1, TCout)          f32 folded BN scale (gamma / sqrt(var + eps))
    bias_ref:  (1, TCout)          f32 folded BN bias  (beta - mean * scale)
    o_ref:     (1, H*W, TCout)     output (spatial flattened -> lane-dense stores)
    scratch:   () if n_cin_tiles == 1 else (acc_ref,), acc_ref: (H*W, TCout) f32
    """
    ci = pl.program_id(2)
    multi_ci = n_cin_tiles > 1
    acc_ref = scratch[0] if multi_ci else None

    TCin = x_ref.shape[-1]
    TCout = o_ref.shape[-1]
    THW = TH * W

    # Hoisted once per grid step (JAX does not CSE broadcast_in_dim).
    scale_b = jnp.broadcast_to(scale_ref[0], (THW, TCout))
    bias_b = jnp.broadcast_to(bias_ref[0], (THW, TCout))

    def strip_body(s, carry):
        r0 = s * TH      # first output row of this strip
        q0 = s * THW     # offset of this strip in the flattened H*W axis
        if not isinstance(s, int) and THW % 8 == 0:
            q0 = pl.multiple_of(q0, 8)

        # Register-resident f32 accumulator for this strip / Cin tile.
        acc = jnp.zeros((THW, TCout), dtype=jnp.float32)
        # Dilated KxK conv = K*K shifted 1x1 convs (bf16 MXU matmuls, f32 acc).
        for kh in range(K):
            for kw in range(K):
                patch = x_ref[0, pl.ds(r0 + kh * rate, TH),
                              kw * rate:kw * rate + W, :]
                # (TH, W, TCin) -> (TH*W, TCin): layout-free when W % 8 == 0
                # (the wrapper only strips rows, never the W axis).
                acc = acc + jnp.dot(patch.reshape(THW, TCin), w_ref[kh, kw],
                                    preferred_element_type=jnp.float32)

        if multi_ci:
            @pl.when(ci == 0)
            def _():
                acc_ref[pl.ds(q0, THW)] = acc

            @pl.when(ci != 0)
            def _():
                acc_ref[pl.ds(q0, THW)] += acc

            @pl.when(ci == n_cin_tiles - 1)
            def _():
                y = acc_ref[pl.ds(q0, THW)] * scale_b + bias_b
                o_ref[0, pl.ds(q0, THW)] = jnp.maximum(y, 0.0).astype(o_ref.dtype)
        else:
            y = acc * scale_b + bias_b
            o_ref[0, pl.ds(q0, THW)] = jnp.maximum(y, 0.0).astype(o_ref.dtype)
        return carry

    if n_strips == 1:
        strip_body(0, 0)
    else:
        lax.fori_loop(0, n_strips, strip_body, 0)


def _pick_channel_tile(C, max_tile):
    """Largest multiple-of-128 tile dividing C (capped), else the full C."""
    if C % 128 != 0:
        return C  # block must equal the full dim ((8,128) rule)
    t = min(max_tile, C)
    t -= t % 128
    t = max(t, 128)
    while C % t != 0:
        t -= 128
    return t


def _pick_row_strip(H, W, TCout, budget_bytes=128 * 1024):
    """Row-strip height: divides H, keeps the f32 strip accumulator small."""
    if W % 8 != 0:
        return H  # keep strip starts sublane-aligned
    TH = H
    while TH > 1 and TH * W * TCout * 4 > budget_bytes:
        TH -= 1
        while TH > 1 and H % TH != 0:
            TH -= 1
    return TH


def conv_bn_relu_forward(x_nchw, weight, gamma, beta, running_mean, running_var,
                         *, dilation=1, eps=1e-5, out_dtype=None,
                         max_cin_tile=512, max_cout_tile=256):
    """Fused Conv2d(bias=False, stride=1, 'same' pad) + BatchNorm2d(eval) + ReLU.

    x_nchw: (N, Cin, H, W).  weight: (Cout, Cin, K, K).
    For K > 1 the conv uses dilation `dilation` and padding dilation*(K-1)//2,
    matching the Resnet blocks (3x3 convs with padding=dilation).
    """
    if out_dtype is None:
        out_dtype = x_nchw.dtype
    N, Cin, H, W = x_nchw.shape
    Cout, Cin_w, K, K2 = weight.shape
    assert K == K2 and Cin_w == Cin
    rate = dilation if K > 1 else 1
    pad = rate * (K - 1) // 2

    # ---- glue (plain JAX): layout, zero pad, bf16 cast, BN folding ----------
    x_nhwc = jnp.transpose(x_nchw, (0, 2, 3, 1)).astype(jnp.bfloat16)
    if pad > 0:
        x_nhwc = jnp.pad(x_nhwc, ((0, 0), (pad, pad), (pad, pad), (0, 0)))
    Hp, Wp = H + 2 * pad, W + 2 * pad
    w_kkio = jnp.transpose(weight, (2, 3, 1, 0)).astype(jnp.bfloat16)  # (K,K,Ci,Co)

    scale = (gamma.astype(jnp.float32) /
             jnp.sqrt(running_var.astype(jnp.float32) + eps))
    bias = beta.astype(jnp.float32) - running_mean.astype(jnp.float32) * scale
    scale2d = scale.reshape(1, Cout)
    bias2d = bias.reshape(1, Cout)

    # ---- tiling --------------------------------------------------------------
    TCin = _pick_channel_tile(Cin, max_cin_tile)
    TCout = _pick_channel_tile(Cout, max_cout_tile)
    n_ci = Cin // TCin
    n_co = Cout // TCout
    TH = _pick_row_strip(H, W, TCout)
    n_strips = H // TH

    kernel = functools.partial(
        _conv_bn_relu_kernel,
        K=K, rate=rate, W=W, TH=TH, n_strips=n_strips, n_cin_tiles=n_ci)

    scratch_shapes = []
    if n_ci > 1:
        scratch_shapes.append(pltpu.VMEM((H * W, TCout), jnp.float32))

    # Scoped-VMEM budget sized to the double-buffered working set (+ headroom).
    bpe_out = jnp.dtype(out_dtype).itemsize
    x_blk = Hp * Wp * TCin * 2
    w_blk = K * K * TCin * TCout * 2
    o_blk = H * W * TCout * bpe_out
    acc_b = H * W * TCout * 4 if n_ci > 1 else 0
    working = 2 * (x_blk + w_blk + o_blk) + acc_b + 2 * Cout * 4 + (2 << 20)
    vmem_limit = int(min(max(working, 32 * 1024 * 1024), 64 * 1024 * 1024))

    out_flat = pl.pallas_call(
        kernel,
        out_shape=jax.ShapeDtypeStruct((N, H * W, Cout), out_dtype),
        grid_spec=pltpu.PrefetchScalarGridSpec(
            num_scalar_prefetch=0,
            grid=(N, n_co, n_ci),
            in_specs=[
                pl.BlockSpec((1, Hp, Wp, TCin), lambda n, co, ci: (n, 0, 0, ci)),
                pl.BlockSpec((K, K, TCin, TCout), lambda n, co, ci: (0, 0, ci, co)),
                pl.BlockSpec((1, TCout), lambda n, co, ci: (0, co)),
                pl.BlockSpec((1, TCout), lambda n, co, ci: (0, co)),
            ],
            out_specs=pl.BlockSpec((1, H * W, TCout), lambda n, co, ci: (n, 0, co)),
            scratch_shapes=scratch_shapes,
        ),
        compiler_params=pltpu.CompilerParams(
            dimension_semantics=("parallel", "parallel", "arbitrary"),
            vmem_limit_bytes=vmem_limit,
        ),
    )(x_nhwc, w_kkio, scale2d, bias2d)

    out_nhwc = out_flat.reshape(N, H, W, Cout)
    return jnp.transpose(out_nhwc, (0, 3, 1, 2))  # back to NCHW


def _reference(x_nchw, weight, gamma, beta, mean, var, *, dilation=1, eps=1e-5):
    """Pure-JAX reference with the same bf16-in / f32-accumulate numerics."""
    K = weight.shape[2]
    rate = dilation if K > 1 else 1
    pad = rate * (K - 1) // 2
    y = lax.conv_general_dilated(
        x_nchw.astype(jnp.bfloat16), weight.astype(jnp.bfloat16),
        window_strides=(1, 1), padding=((pad, pad), (pad, pad)),
        rhs_dilation=(rate, rate),
        dimension_numbers=("NCHW", "OIHW", "NCHW"),
        preferred_element_type=jnp.float32)
    scale = (gamma / jnp.sqrt(var + eps)).reshape(1, -1, 1, 1)
    bias = (beta - mean * gamma / jnp.sqrt(var + eps)).reshape(1, -1, 1, 1)
    return jnp.maximum(y * scale + bias, 0.0)


if __name__ == "__main__":
    key = jax.random.PRNGKey(0)
    ks = jax.random.split(key, 16)

    # ---- small shapes: 3x3 dilated conv (layer3/4 style) and 1x1 conv -------
    N, Cin, H, W, Cout = 2, 4, 16, 16, 8
    x = jax.random.normal(ks[0], (N, Cin, H, W), dtype=jnp.float32)
    w3 = jax.random.normal(ks[1], (Cout, Cin, 3, 3), dtype=jnp.float32) * 0.1
    w1 = jax.random.normal(ks[2], (Cout, Cin, 1, 1), dtype=jnp.float32) * 0.1
    gamma = 1.0 + 0.1 * jax.random.normal(ks[3], (Cout,), dtype=jnp.float32)
    beta = 0.1 * jax.random.normal(ks[4], (Cout,), dtype=jnp.float32)
    mean = 0.1 * jax.random.normal(ks[5], (Cout,), dtype=jnp.float32)
    var = jnp.abs(1.0 + 0.1 * jax.random.normal(ks[6], (Cout,), dtype=jnp.float32))

    out3 = jax.block_until_ready(
        conv_bn_relu_forward(x, w3, gamma, beta, mean, var, dilation=2))
    ref3 = _reference(x, w3, gamma, beta, mean, var, dilation=2)
    np.testing.assert_allclose(np.asarray(out3), np.asarray(ref3),
                               atol=2e-3, rtol=2e-3)

    out1 = jax.block_until_ready(
        conv_bn_relu_forward(x, w1, gamma, beta, mean, var, dilation=1))
    ref1 = _reference(x, w1, gamma, beta, mean, var, dilation=1)
    np.testing.assert_allclose(np.asarray(out1), np.asarray(ref1),
                               atol=2e-3, rtol=2e-3)

    # ---- channel-tiled case: exercises the Cin-reduction grid axis, the
    #      Cout tiling and the in-kernel row strips (Resnet-scale channels) ---
    N2, Cin2, H2, W2, Cout2 = 1, 256, 24, 24, 256
    x2 = jax.random.normal(ks[7], (N2, Cin2, H2, W2), dtype=jnp.float32)
    w2 = jax.random.normal(ks[8], (Cout2, Cin2, 3, 3), dtype=jnp.float32) * 0.05
    gamma2 = 1.0 + 0.1 * jax.random.normal(ks[9], (Cout2,), dtype=jnp.float32)
    beta2 = 0.1 * jax.random.normal(ks[10], (Cout2,), dtype=jnp.float32)
    mean2 = 0.1 * jax.random.normal(ks[11], (Cout2,), dtype=jnp.float32)
    var2 = jnp.abs(1.0 + 0.1 * jax.random.normal(ks[12], (Cout2,), dtype=jnp.float32))

    out2 = jax.block_until_ready(
        conv_bn_relu_forward(x2, w2, gamma2, beta2, mean2, var2, dilation=2,
                             max_cin_tile=128, max_cout_tile=128))
    ref2 = _reference(x2, w2, gamma2, beta2, mean2, var2, dilation=2)
    np.testing.assert_allclose(np.asarray(out2), np.asarray(ref2),
                               atol=5e-3, rtol=5e-3)

    print("KERNEL_OK")
</pallas_src>

<mosaic_0001>
module attributes {stable_mosaic.version = 11 : i64} {
  func.func @_conv_bn_relu_kernel(%arg0: i32, %arg1: i32, %arg2: i32, %arg3: memref<1x20x20x4xbf16, #tpu.memory_space<vmem>>, %arg4: memref<3x3x4x8xbf16, #tpu.memory_space<vmem>>, %arg5: memref<1x8xf32, #tpu.memory_space<vmem>>, %arg6: memref<1x8xf32, #tpu.memory_space<vmem>>, %arg7: memref<1x256x8xf32, #tpu.memory_space<vmem>>) attributes {dimension_semantics = [#tpu.dimension_semantics<parallel>, #tpu.dimension_semantics<parallel>, #tpu.dimension_semantics<arbitrary>], iteration_bounds = array<i64: 2, 1, 1>, scalar_prefetch = 0 : i64, scratch_operands = 0 : i64, tpu.core_type = #tpu.core_type<tc>, window_params = [{transform_indices = @transform_0, window_bounds = array<i64: 1, 20, 20, 4>}, {transform_indices = @transform_1, window_bounds = array<i64: 3, 3, 4, 8>}, {transform_indices = @transform_2, window_bounds = array<i64: 1, 8>}, {transform_indices = @transform_3, window_bounds = array<i64: 1, 8>}, {transform_indices = @transform_4, window_bounds = array<i64: 1, 256, 8>}]} {
    %c0 = arith.constant 0 : index
    %c0_0 = arith.constant 0 : index
    %0 = vector.load %arg5[%c0, %c0_0] : memref<1x8xf32, #tpu.memory_space<vmem>>, vector<1x8xf32>
    %1 = vector.shape_cast %0 : vector<1x8xf32> to vector<8xf32>
    %2 = vector.shape_cast %1 : vector<8xf32> to vector<1x8xf32>
    %3 = vector.broadcast %2 : vector<1x8xf32> to vector<256x8xf32>
    %c0_1 = arith.constant 0 : index
    %c0_2 = arith.constant 0 : index
    %4 = vector.load %arg6[%c0_1, %c0_2] : memref<1x8xf32, #tpu.memory_space<vmem>>, vector<1x8xf32>
    %5 = vector.shape_cast %4 : vector<1x8xf32> to vector<8xf32>
    %6 = vector.shape_cast %5 : vector<8xf32> to vector<1x8xf32>
    %7 = vector.broadcast %6 : vector<1x8xf32> to vector<256x8xf32>
    %cst = arith.constant 0.000000e+00 : f32
    %8 = vector.broadcast %cst : f32 to vector<256x8xf32>
    %c0_3 = arith.constant 0 : index
    %c0_4 = arith.constant 0 : index
    %c0_5 = arith.constant 0 : index
    %c0_6 = arith.constant 0 : index
    %9 = vector.load %arg3[%c0_3, %c0_4, %c0_5, %c0_6] : memref<1x20x20x4xbf16, #tpu.memory_space<vmem>>, vector<1x16x16x4xbf16>
    %10 = vector.shape_cast %9 : vector<1x16x16x4xbf16> to vector<16x16x4xbf16>
    %11 = vector.shape_cast %10 : vector<16x16x4xbf16> to vector<256x4xbf16>
    %c0_7 = arith.constant 0 : index
    %c0_8 = arith.constant 0 : index
    %c0_9 = arith.constant 0 : index
    %c0_10 = arith.constant 0 : index
    %12 = vector.load %arg4[%c0_7, %c0_8, %c0_9, %c0_10] : memref<3x3x4x8xbf16, #tpu.memory_space<vmem>>, vector<1x1x4x8xbf16>
    %13 = vector.shape_cast %12 : vector<1x1x4x8xbf16> to vector<4x8xbf16>
    %cst_11 = arith.constant dense<0.000000e+00> : vector<256x8xf32>
    %14 = tpu.matmul %11, %13, %cst_11 {dimension_numbers = #tpu.dot_dimension_numbers<[1], [0], [0], [1], [0, 0, 1, 1], [], []>} : vector<256x4xbf16>, vector<4x8xbf16>, vector<256x8xf32> -> vector<256x8xf32>
    %15 = arith.addf %8, %14 : vector<256x8xf32>
    %c0_12 = arith.constant 0 : index
    %c0_13 = arith.constant 0 : index
    %c2 = arith.constant 2 : index
    %c0_14 = arith.constant 0 : index
    %16 = vector.load %arg3[%c0_12, %c0_13, %c2, %c0_14] : memref<1x20x20x4xbf16, #tpu.memory_space<vmem>>, vector<1x16x16x4xbf16>
    %17 = vector.shape_cast %16 : vector<1x16x16x4xbf16> to vector<16x16x4xbf16>
    %18 = vector.shape_cast %17 : vector<16x16x4xbf16> to vector<256x4xbf16>
    %c0_15 = arith.constant 0 : index
    %c1 = arith.constant 1 : index
    %c0_16 = arith.constant 0 : index
    %c0_17 = arith.constant 0 : index
    %19 = vector.load %arg4[%c0_15, %c1, %c0_16, %c0_17] : memref<3x3x4x8xbf16, #tpu.memory_space<vmem>>, vector<1x1x4x8xbf16>
    %20 = vector.shape_cast %19 : vector<1x1x4x8xbf16> to vector<4x8xbf16>
    %cst_18 = arith.constant dense<0.000000e+00> : vector<256x8xf32>
    %21 = tpu.matmul %18, %20, %cst_18 {dimension_numbers = #tpu.dot_dimension_numbers<[1], [0], [0], [1], [0, 0, 1, 1], [], []>} : vector<256x4xbf16>, vector<4x8xbf16>, vector<256x8xf32> -> vector<256x8xf32>
    %22 = arith.addf %15, %21 : vector<256x8xf32>
    %c0_19 = arith.constant 0 : index
    %c0_20 = arith.constant 0 : index
    %c4 = arith.constant 4 : index
    %c0_21 = arith.constant 0 : index
    %23 = vector.load %arg3[%c0_19, %c0_20, %c4, %c0_21] : memref<1x20x20x4xbf16, #tpu.memory_space<vmem>>, vector<1x16x16x4xbf16>
    %24 = vector.shape_cast %23 : vector<1x16x16x4xbf16> to vector<16x16x4xbf16>
    %25 = vector.shape_cast %24 : vector<16x16x4xbf16> to vector<256x4xbf16>
    %c0_22 = arith.constant 0 : index
    %c2_23 = arith.constant 2 : index
    %c0_24 = arith.constant 0 : index
    %c0_25 = arith.constant 0 : index
    %26 = vector.load %arg4[%c0_22, %c2_23, %c0_24, %c0_25] : memref<3x3x4x8xbf16, #tpu.memory_space<vmem>>, vector<1x1x4x8xbf16>
    %27 = vector.shape_cast %26 : vector<1x1x4x8xbf16> to vector<4x8xbf16>
    %cst_26 = arith.constant dense<0.000000e+00> : vector<256x8xf32>
    %28 = tpu.matmul %25, %27, %cst_26 {dimension_numbers = #tpu.dot_dimension_numbers<[1], [0], [0], [1], [0, 0, 1, 1], [], []>} : vector<256x4xbf16>, vector<4x8xbf16>, vector<256x8xf32> -> vector<256x8xf32>
    %29 = arith.addf %22, %28 : vector<256x8xf32>
    %c0_27 = arith.constant 0 : index
    %c2_28 = arith.constant 2 : index
    %c0_29 = arith.constant 0 : index
    %c0_30 = arith.constant 0 : index
    %30 = vector.load %arg3[%c0_27, %c2_28, %c0_29, %c0_30] : memref<1x20x20x4xbf16, #tpu.memory_space<vmem>>, vector<1x16x16x4xbf16>
    %31 = vector.shape_cast %30 : vector<1x16x16x4xbf16> to vector<16x16x4xbf16>
    %32 = vector.shape_cast %31 : vector<16x16x4xbf16> to vector<256x4xbf16>
    %c1_31 = arith.constant 1 : index
    %c0_32 = arith.constant 0 : index
    %c0_33 = arith.constant 0 : index
    %c0_34 = arith.constant 0 : index
    %33 = vector.load %arg4[%c1_31, %c0_32, %c0_33, %c0_34] : memref<3x3x4x8xbf16, #tpu.memory_space<vmem>>, vector<1x1x4x8xbf16>
    %34 = vector.shape_cast %33 : vector<1x1x4x8xbf16> to vector<4x8xbf16>
    %cst_35 = arith.constant dense<0.000000e+00> : vector<256x8xf32>
    %35 = tpu.matmul %32, %34, %cst_35 {dimension_numbers = #tpu.dot_dimension_numbers<[1], [0], [0], [1], [0, 0, 1, 1], [], []>} : vector<256x4xbf16>, vector<4x8xbf16>, vector<256x8xf32> -> vector<256x8xf32>
    %36 = arith.addf %29, %35 : vector<256x8xf32>
    %c0_36 = arith.constant 0 : index
    %c2_37 = arith.constant 2 : index
    %c2_38 = arith.constant 2 : index
    %c0_39 = arith.constant 0 : index
    %37 = vector.load %arg3[%c0_36, %c2_37, %c2_38, %c0_39] : memref<1x20x20x4xbf16, #tpu.memory_space<vmem>>, vector<1x16x16x4xbf16>
    %38 = vector.shape_cast %37 : vector<1x16x16x4xbf16> to vector<16x16x4xbf16>
    %39 = vector.shape_cast %38 : vector<16x16x4xbf16> to vector<256x4xbf16>
    %c1_40 = arith.constant 1 : index
    %c1_41 = arith.constant 1 : index
    %c0_42 = arith.constant 0 : index
    %c0_43 = arith.constant 0 : index
    %40 = vector.load %arg4[%c1_40, %c1_41, %c0_42, %c0_43] : memref<3x3x4x8xbf16, #tpu.memory_space<vmem>>, vector<1x1x4x8xbf16>
    %41 = vector.shape_cast %40 : vector<1x1x4x8xbf16> to vector<4x8xbf16>
    %cst_44 = arith.constant dense<0.000000e+00> : vector<256x8xf32>
    %42 = tpu.matmul %39, %41, %cst_44 {dimension_numbers = #tpu.dot_dimension_numbers<[1], [0], [0], [1], [0, 0, 1, 1], [], []>} : vector<256x4xbf16>, vector<4x8xbf16>, vector<256x8xf32> -> vector<256x8xf32>
    %43 = arith.addf %36, %42 : vector<256x8xf32>
    %c0_45 = arith.constant 0 : index
    %c2_46 = arith.constant 2 : index
    %c4_47 = arith.constant 4 : index
    %c0_48 = arith.constant 0 : index
    %44 = vector.load %arg3[%c0_45, %c2_46, %c4_47, %c0_48] : memref<1x20x20x4xbf16, #tpu.memory_space<vmem>>, vector<1x16x16x4xbf16>
    %45 = vector.shape_cast %44 : vector<1x16x16x4xbf16> to vector<16x16x4xbf16>
    %46 = vector.shape_cast %45 : vector<16x16x4xbf16> to vector<256x4xbf16>
    %c1_49 = arith.constant 1 : index
    %c2_50 = arith.constant 2 : index
    %c0_51 = arith.constant 0 : index
    %c0_52 = arith.constant 0 : index
    %47 = vector.load %arg4[%c1_49, %c2_50, %c0_51, %c0_52] : memref<3x3x4x8xbf16, #tpu.memory_space<vmem>>, vector<1x1x4x8xbf16>
    %48 = vector.shape_cast %47 : vector<1x1x4x8xbf16> to vector<4x8xbf16>
    %cst_53 = arith.constant dense<0.000000e+00> : vector<256x8xf32>
    %49 = tpu.matmul %46, %48, %cst_53 {dimension_numbers = #tpu.dot_dimension_numbers<[1], [0], [0], [1], [0, 0, 1, 1], [], []>} : vector<256x4xbf16>, vector<4x8xbf16>, vector<256x8xf32> -> vector<256x8xf32>
    %50 = arith.addf %43, %49 : vector<256x8xf32>
    %c0_54 = arith.constant 0 : index
    %c4_55 = arith.constant 4 : index
    %c0_56 = arith.constant 0 : index
    %c0_57 = arith.constant 0 : index
    %51 = vector.load %arg3[%c0_54, %c4_55, %c0_56, %c0_57] : memref<1x20x20x4xbf16, #tpu.memory_space<vmem>>, vector<1x16x16x4xbf16>
    %52 = vector.shape_cast %51 : vector<1x16x16x4xbf16> to vector<16x16x4xbf16>
    %53 = vector.shape_cast %52 : vector<16x16x4xbf16> to vector<256x4xbf16>
    %c2_58 = arith.constant 2 : index
    %c0_59 = arith.constant 0 : index
    %c0_60 = arith.constant 0 : index
    %c0_61 = arith.constant 0 : index
    %54 = vector.load %arg4[%c2_58, %c0_59, %c0_60, %c0_61] : memref<3x3x4x8xbf16, #tpu.memory_space<vmem>>, vector<1x1x4x8xbf16>
    %55 = vector.shape_cast %54 : vector<1x1x4x8xbf16> to vector<4x8xbf16>
    %cst_62 = arith.constant dense<0.000000e+00> : vector<256x8xf32>
    %56 = tpu.matmul %53, %55, %cst_62 {dimension_numbers = #tpu.dot_dimension_numbers<[1], [0], [0], [1], [0, 0, 1, 1], [], []>} : vector<256x4xbf16>, vector<4x8xbf16>, vector<256x8xf32> -> vector<256x8xf32>
    %57 = arith.addf %50, %56 : vector<256x8xf32>
    %c0_63 = arith.constant 0 : index
    %c4_64 = arith.constant 4 : index
    %c2_65 = arith.constant 2 : index
    %c0_66 = arith.constant 0 : index
    %58 = vector.load %arg3[%c0_63, %c4_64, %c2_65, %c0_66] : memref<1x20x20x4xbf16, #tpu.memory_space<vmem>>, vector<1x16x16x4xbf16>
    %59 = vector.shape_cast %58 : vector<1x16x16x4xbf16> to vector<16x16x4xbf16>
    %60 = vector.shape_cast %59 : vector<16x16x4xbf16> to vector<256x4xbf16>
    %c2_67 = arith.constant 2 : index
    %c1_68 = arith.constant 1 : index
    %c0_69 = arith.constant 0 : index
    %c0_70 = arith.constant 0 : index
    %61 = vector.load %arg4[%c2_67, %c1_68, %c0_69, %c0_70] : memref<3x3x4x8xbf16, #tpu.memory_space<vmem>>, vector<1x1x4x8xbf16>
    %62 = vector.shape_cast %61 : vector<1x1x4x8xbf16> to vector<4x8xbf16>
    %cst_71 = arith.constant dense<0.000000e+00> : vector<256x8xf32>
    %63 = tpu.matmul %60, %62, %cst_71 {dimension_numbers = #tpu.dot_dimension_numbers<[1], [0], [0], [1], [0, 0, 1, 1], [], []>} : vector<256x4xbf16>, vector<4x8xbf16>, vector<256x8xf32> -> vector<256x8xf32>
    %64 = arith.addf %57, %63 : vector<256x8xf32>
    %c0_72 = arith.constant 0 : index
    %c4_73 = arith.constant 4 : index
    %c4_74 = arith.constant 4 : index
    %c0_75 = arith.constant 0 : index
    %65 = vector.load %arg3[%c0_72, %c4_73, %c4_74, %c0_75] : memref<1x20x20x4xbf16, #tpu.memory_space<vmem>>, vector<1x16x16x4xbf16>
    %66 = vector.shape_cast %65 : vector<1x16x16x4xbf16> to vector<16x16x4xbf16>
    %67 = vector.shape_cast %66 : vector<16x16x4xbf16> to vector<256x4xbf16>
    %c2_76 = arith.constant 2 : index
    %c2_77 = arith.constant 2 : index
    %c0_78 = arith.constant 0 : index
    %c0_79 = arith.constant 0 : index
    %68 = vector.load %arg4[%c2_76, %c2_77, %c0_78, %c0_79] : memref<3x3x4x8xbf16, #tpu.memory_space<vmem>>, vector<1x1x4x8xbf16>
    %69 = vector.shape_cast %68 : vector<1x1x4x8xbf16> to vector<4x8xbf16>
    %cst_80 = arith.constant dense<0.000000e+00> : vector<256x8xf32>
    %70 = tpu.matmul %67, %69, %cst_80 {dimension_numbers = #tpu.dot_dimension_numbers<[1], [0], [0], [1], [0, 0, 1, 1], [], []>} : vector<256x4xbf16>, vector<4x8xbf16>, vector<256x8xf32> -> vector<256x8xf32>
    %71 = arith.addf %64, %70 : vector<256x8xf32>
    %72 = arith.mulf %71, %3 : vector<256x8xf32>
    %73 = arith.addf %72, %7 : vector<256x8xf32>
    %cst_81 = arith.constant 0.000000e+00 : f32
    %74 = vector.broadcast %cst_81 : f32 to vector<256x8xf32>
    %75 = arith.maximumf %73, %74 : vector<256x8xf32>
    %c0_82 = arith.constant 0 : index
    %c0_83 = arith.constant 0 : index
    %c0_84 = arith.constant 0 : index
    %76 = vector.load %arg7[%c0_82, %c0_83, %c0_84] : memref<1x256x8xf32, #tpu.memory_space<vmem>>, vector<1x256x8xf32>
    %77 = vector.shape_cast %76 : vector<1x256x8xf32> to vector<256x8xf32>
    %78 = vector.shape_cast %75 : vector<256x8xf32> to vector<1x256x8xf32>
    tpu.vector_store %arg7[%c0_82, %c0_83, %c0_84], %78 {strides = array<i32>} : memref<1x256x8xf32, #tpu.memory_space<vmem>>, vector<1x256x8xf32>,
    return
  }
  func.func @transform_0(%arg0: i32, %arg1: i32, %arg2: i32) -> (i32, i32, i32, i32) {
    %c0_i32 = arith.constant 0 : i32
    %c0_i32_0 = arith.constant 0 : i32
    %c0_i32_1 = arith.constant 0 : i32
    return %arg0, %c0_i32, %c0_i32_0, %arg2 : i32, i32, i32, i32
  }
  func.func @transform_1(%arg0: i32, %arg1: i32, %arg2: i32) -> (i32, i32, i32, i32) {
    %c0_i32 = arith.constant 0 : i32
    %c0_i32_0 = arith.constant 0 : i32
    %c0_i32_1 = arith.constant 0 : i32
    return %c0_i32, %c0_i32_0, %arg2, %arg1 : i32, i32, i32, i32
  }
  func.func @transform_2(%arg0: i32, %arg1: i32, %arg2: i32) -> (i32, i32) {
    %c0_i32 = arith.constant 0 : i32
    %c0_i32_0 = arith.constant 0 : i32
    return %c0_i32, %arg1 : i32, i32
  }
  func.func @transform_3(%arg0: i32, %arg1: i32, %arg2: i32) -> (i32, i32) {
    %c0_i32 = arith.constant 0 : i32
    %c0_i32_0 = arith.constant 0 : i32
    return %c0_i32, %arg1 : i32, i32
  }
  func.func @transform_4(%arg0: i32, %arg1: i32, %arg2: i32) -> (i32, i32, i32) {
    %c0_i32 = arith.constant 0 : i32
    %c0_i32_0 = arith.constant 0 : i32
    return %arg0, %c0_i32, %arg1 : i32, i32, i32
  }
}

</mosaic_0001>

<bundles_post_ra>
// kernel: tpu_custom_call.1
= control target key start
LH: loop header
LB: loop body
LE: loop exit
PB: predicated region body
PF: predicated region fallthrough
CT: control target
= control target key end

     0   :  { %s5962_s15 = smov 0   ;;  %s5964_s16 = smov 0   ;;  %s7259_s0 = inlined_call_operand.vmem [shape: bf16[2,20,20,4], index: 0, kind: input, shape index: {}]   ;;  %s7260_s1 = inlined_call_operand.vmem [shape: bf16[3,3,4,8], index: 1, kind: input, shape index: {}]   ;;  %s7261_s2 = inlined_call_operand.vmem [shape: f32[1,8], index: 2, kind: input, shape index: {}]   ;;  %s7262_s3 = inlined_call_operand.vmem [shape: f32[1,8], index: 3, kind: input, shape index: {}]   ;;  %s7263_s4 = inlined_call_operand.vmem [shape: f32[2,256,8], index: 4, kind: output, shape index: {}]  }
   0x1   :  { %s5966_s17 = smov 0  }
   0x2 LB: > { %s33_s18 = sadd.s32 1, %s5931_s16  ;;  %p4475_p0 = scmp.ge.s32.totalorder %s5935_s17, 1  ;;  %s5935_s17 = sphi %s5966_s17, %s14_s17   ;;  %s5931_s16 = sphi %s5964_s16, %s7269_s16   ;;  %s5927_s15 = sphi %s5962_s15, %s7268_s15  }
   0x3   : > { %p35_p1 = scmp.ge.s32.totalorder %s33_s18, 2  ;;  %p218_p2 = scmp.lt.s32.totalorder %s5935_s17, 3 }
   0x5   : > { %s7271_s18 = smov (%p35_p1, %s33_s18), 0  ;;  %p219_p3 = pnand %p4475_p0, %p218_p2 }
   0x6   : > { %v4497_v0 = vld [vmem:[%s7260_s1 + $0x2] sm:$0x3] (!%p219_p3)  ;;  %vm634_vm0 = vcmask (!%p219_p3), 1041408   ;;  %v4740_v1 = vld [vmem:[%s7260_s1 + $0x8] sm:$0x3] (!%p219_p3)  ;;  %p263_p4 = scmp.lt.s32.totalorder (!%p219_p3), %s5927_s15, 1 }
   0x7   : > { %222 = sbr.rel (%p219_p3) target bundleno = 536 (0x218), region = 36  ;;  %5817 = vmatprep.subr.msk.bf16.mxu1 (!%p219_p3), %vm634_vm0, %v4497_v0  ;;  %5821 = vmatprep.subr.msk.bf16.mxu0 (!%p219_p3), %vm634_vm0, %v4740_v1  ;;  %v636_v2 = vsel (!%p219_p3), %vm634_vm0, %v4497_v0, 0  ;;  %v5990_v3 = vsel (!%p219_p3), %vm634_vm0, %v4740_v1, 0  ;;  %v339_v4 = vld [vmem:[%s7260_s1] sm:$0x3] (!%p219_p3)  ;;  %vm420_vm1 = vcmask (!%p219_p3), 1042432  }
   0x8   : > { %5254 = vmatpush3.bf16.msra.mxu1 (!%p219_p3), %v636_v2  ;;  %5390 = vmatpush3.bf16.msra.mxu0 (!%p219_p3), %v5990_v3  ;;  %v4821_v5 = vld [vmem:[%s7260_s1 + $0xa] sm:$0x3] (!%p219_p3)  ;;  %vm421_vm2 = vcmask (!%p219_p3), 1046532   ;;  %vm585_vm4 = vcmask (!%p219_p3), 31744   ;;  %v912_v35 = vsel (!%p219_p3), %vm634_vm0, %v339_v4, 0  ;;  %vm1140_vm5 = vcmask (!%p219_p3), 1045508  }
   0x9   : > { %5818 = vmatprep.subr.msk.bf16.mxu1 (!%p219_p3), %vm634_vm0, %v339_v4  ;;  %5823 = vmatprep.subr.msk.bf16.mxu0 (!%p219_p3), %vm634_vm0, %v4821_v5  ;;  %vm6009_vm3 = vmor (!%p219_p3), %vm420_vm1, %vm421_vm2  ;;  %v2684_v40 = vsel (!%p219_p3), %vm634_vm0, %v4821_v5, 0  ;;  %v6062_v49 = vld [vmem:[%s7260_s1 + $0x4] sm:$0x3] (!%p219_p3)  ;;  %vm4306_vm7 = vcmask (!%p219_p3), 64512  }
   0xa   : > { %vm6214_vm6 = vmor (!%p219_p3), %vm634_vm0, %vm1140_vm5 }
   0xe   : > { %s7273_s15 = smov (!%p263_p4, %s5927_s15), 1 }
   0xf   : > { %s5827_s27 = smul.u32 240, %s7273_s15  ;;  %s5099_s25 = sshll.u32 %s7273_s15, 8 }
  0x10   : > { %s7118_s28 = scalar_lea.vmem %s7263_s4, %s5099_s25 }
  0x11   : > { %s6007_s30 = scalar_lea.vmem %s7259_s0, %s5827_s27 }
  0x12   : > { %v6014_v7 = vld [vmem:[%s6007_s30 + $0x4] sm:$0xf]  ;;  %v340_v8 = vld [vmem:[%s6007_s30] sm:$0xe]  ;;  %v341_v9 = vld [vmem:[%s6007_s30 + $0x8] sm:$0x1] }
  0x13   : > { %v4481_v10 = vrot.slane %v340_v8, 9  ;;  %v425_v11 = vrot.slane %v6014_v7, 5  ;;  %v428_v12 = vrot.slane %v341_v9, 5  ;;  %v4676_v13 = vld [vmem:[%s6007_s30 + $0x18] sm:$0xe] }
  0x14   : > { %v6021_v14 = vld [vmem:[%s6007_s30 + $0x1c] sm:$0xf]  ;;  %v4678_v15 = vld [vmem:[%s6007_s30 + $0x20] sm:$0x1]  ;;  %v4724_v16 = vrot.slane %v4676_v13, 9 }
  0x15   : > { %v426_v17 = vsel %vm6009_vm3, %v4481_v10, %v425_v11  ;;  %v427_v18 = vrot.slane %v425_v11, 4  ;;  %v2005_v19 = vrot.slane %v6021_v14, 5  ;;  %v2008_v20 = vrot.slane %v4678_v15, 5  ;;  %v6028_v21 = vld [vmem:[%s6007_s30 + $0x10] sm:$0xf] }
  0x16   : > { %v2475_v22 = vrot.slane %v6021_v14, 6  ;;  %v342_v23 = vld [vmem:[%s6007_s30 + $0xc] sm:$0xe]  ;;  %v343_v24 = vld [vmem:[%s6007_s30 + $0x14] sm:$0x1]  ;;  %v432_v25 = vrot.slane %v6028_v21, 5 }
  0x17   : > { %v429_v26 = vsel %vm6009_vm3, %v427_v18, %v428_v12  ;;  %v2006_v27 = vsel %vm6009_vm3, %v4724_v16, %v2005_v19  ;;  %v2007_v28 = vrot.slane %v2005_v19, 4  ;;  %v4482_v29 = vrot.slane %v342_v23, 9  ;;  %v4679_v30 = vld [vmem:[%s6007_s30 + $0x24] sm:$0xe]  ;;  %v6040_v31 = vld [vmem:[%s6007_s30 + $0x28] sm:$0xf] }
  0x18   : > { %v4498_v32 = vcombine.low %v426_v17, %v429_v26  ;;  %v434_v33 = vrot.slane %v432_v25, 4  ;;  %v435_v34 = vrot.slane %v343_v24, 5  ;;  %v4681_v36 = vld [vmem:[%s6007_s30 + $0x2c] sm:$0x1]  ;;  %v4725_v39 = vrot.slane %v4679_v30, 9 }
  0x19   : > { %v2009_v37 = vsel %vm6009_vm3, %v2007_v28, %v2008_v20  ;;  %v433_v38 = vsel %vm6009_vm3, %v4482_v29, %v432_v25  ;;  %v6050_v41 = vld [vmem:[%s6007_s30 + $0x1c] sm:$0xf]  ;;  %v344_v42 = vld [vmem:[%s6007_s30 + $0x18] sm:$0xe]  ;;  %v2012_v45 = vrot.slane %v6040_v31, 5  ;;  %v2015_v46 = vrot.slane %v4681_v36, 5 }
  0x1a   : > { %5255 = vmatprep.mubr.msk.bf16.mxu1 %vm585_vm4, %v4498_v32  ;;  %v4741_v43 = vcombine.low %v2006_v27, %v2009_v37  ;;  %v436_v44 = vsel %vm6009_vm3, %v434_v33, %v435_v34  ;;  %v345_v47 = vld [vmem:[%s6007_s30 + $0x20] sm:$0x1]  ;;  %v4682_v48 = vld [vmem:[%s6007_s30 + $0x30] sm:$0xe]  ;;  %v6066_v50 = vrot.slane %v2475_v22, 4  ;;  %v2482_v52 = vrot.slane %v6040_v31, 6 }
  0x1b   : > { %v4499_v51 = vcombine.low %v433_v38, %v436_v44  ;;  %v4483_v53 = vrot.slane %v344_v42, 9  ;;  %v6070_v54 = vld [vmem:[%s6007_s30 + $0x34] sm:$0xf]  ;;  %v2013_v55 = vsel %vm6009_vm3, %v4725_v39, %v2012_v45  ;;  %v2014_v56 = vrot.slane %v2012_v45, 4  ;;  %v4684_v59 = vld [vmem:[%s6007_s30 + $0x38] sm:$0x1] }
  0x1c   : > { %5391 = vmatprep.mubr.msk.bf16.mxu0 %vm585_vm4, %v4741_v43  ;;  %v439_v57 = vrot.slane %v6050_v41, 5  ;;  %v442_v58 = vrot.slane %v345_v47, 5  ;;  %v6080_v60 = vrot.slane %v2482_v52, 4  ;;  %v4726_v61 = vrot.slane %v4682_v48, 9  ;;  %v6084_v0 = vld [vmem:[%s6007_s30 + $0x28] sm:$0xf] }
  0x1d   : > { %5256 = vmatmul.mubr.msk.bf16.vlgmr.msra.gmra.mrb[0].mxu1 %vm585_vm4, %v4499_v51  ;;  %v2019_v62 = vrot.slane %v6070_v54, 5  ;;  %v2022_v63 = vrot.slane %v4684_v59, 5  ;;  %v2016_v1 = vsel %vm6009_vm3, %v2014_v56, %v2015_v46  ;;  %v346_v5 = vld [vmem:[%s6007_s30 + $0x24] sm:$0xe]  ;;  %v347_v8 = vld [vmem:[%s6007_s30 + $0x2c] sm:$0x1] }
  0x1e   : > { %5288 = vmatpush3.bf16.msra.mxu1 %v912_v35  ;;  %v440_v2 = vsel %vm6009_vm3, %v4483_v53, %v439_v57  ;;  %v441_v4 = vrot.slane %v439_v57, 4  ;;  %v446_v9 = vrot.slane %v6084_v0, 5  ;;  %v6096_v10 = vld [vmem:[%s7260_s1 + $0xc] sm:$0x3]  ;;  %v4742_v11 = vcombine.low %v2013_v55, %v2016_v1  ;;  %v4685_v16 = vld [vmem:[%s6007_s30 + $0x3c] sm:$0xe] }
  0x1f   : > { %v2020_v12 = vsel %vm6009_vm3, %v4726_v61, %v2019_v62  ;;  %v2021_v13 = vrot.slane %v2019_v62, 4  ;;  %v4484_v15 = vrot.slane %v346_v5, 9  ;;  %v6102_v17 = vld [vmem:[%s6007_s30 + $0x40] sm:$0xf]  ;;  %5819 = vmatprep.subr.msk.bf16.mxu1 %vm634_vm0, %v6062_v49  ;;  %v449_v20 = vrot.slane %v347_v8, 5 }
  0x20   : > { %v443_v18 = vsel %vm6009_vm3, %v441_v4, %v442_v58  ;;  %v448_v19 = vrot.slane %v446_v9, 4  ;;  %v4687_v23 = vld [vmem:[%s6007_s30 + $0x44] sm:$0x1]  ;;  %v4727_v24 = vrot.slane %v4685_v16, 9  ;;  %5392 = vmatmul.mubr.msk.bf16.vlgmr.msra.gmra.mrb[0].mxu0 %vm585_vm4, %v4742_v11  ;;  %v2026_v28 = vrot.slane %v6102_v17, 5 }
  0x21   : > { %v4500_v25 = vcombine.low %v440_v2, %v443_v18  ;;  %v2023_v26 = vsel %vm6009_vm3, %v2021_v13, %v2022_v63  ;;  %v447_v27 = vsel %vm6009_vm3, %v4484_v15, %v446_v9  ;;  %v6116_v29 = vld [vmem:[%s6007_s30 + $0x34] sm:$0xf]  ;;  %v348_v30 = vld [vmem:[%s6007_s30 + $0x30] sm:$0xe]  ;;  %5424 = vmatpush3.bf16.msra.mxu0 %v2684_v40  ;;  %v2029_v34 = vrot.slane %v4687_v23, 5 }
  0x22   : > { %v4743_v32 = vcombine.low %v2020_v12, %v2023_v26  ;;  %v450_v33 = vsel %vm6009_vm3, %v448_v19, %v449_v20  ;;  %v349_v35 = vld [vmem:[%s6007_s30 + $0x38] sm:$0x1]  ;;  %v4485_v36 = vrot.slane %v348_v30, 9  ;;  %v4688_v37 = vld [vmem:[%s6007_s30 + $0x48] sm:$0xe]  ;;  %v2027_v39 = vsel %vm6009_vm3, %v4727_v24, %v2026_v28  ;;  %5824 = vmatprep.subr.msk.bf16.mxu0 %vm634_vm0, %v6096_v10 }
  0x23   : > { %5259 = vmatprep.mubr.msk.bf16.mxu1 %vm585_vm4, %v4500_v25  ;;  %v4501_v38 = vcombine.low %v447_v27, %v450_v33  ;;  %v2028_v42 = vrot.slane %v2026_v28, 4  ;;  %v453_v40 = vrot.slane %v6116_v29, 5  ;;  %v6128_v43 = vld [vmem:[%s6007_s30 + $0x4c] sm:$0xf]  ;;  %v4690_v44 = vld [vmem:[%s6007_s30 + $0x50] sm:$0x1] }
  0x24   : > { %5395 = vmatprep.mubr.msk.bf16.mxu0 %vm585_vm4, %v4743_v32  ;;  %v456_v45 = vrot.slane %v349_v35, 5  ;;  %v4728_v46 = vrot.slane %v4688_v37, 9  ;;  %v2033_v47 = vrot.slane %v6128_v43, 5  ;;  %v2036_v48 = vrot.slane %v4690_v44, 5  ;;  %v6136_v51 = vld [vmem:[%s6007_s30 + $0x40] sm:$0xf] }
  0x25   : > { %5260 = vmatmul.mubr.msk.bf16.gmra.mrb[4].mxu1 %vm585_vm4, %v4501_v38  ;;  %v2030_v53 = vsel %vm6009_vm3, %v2028_v42, %v2029_v34  ;;  %v454_v55 = vsel %vm6009_vm3, %v4485_v36, %v453_v40  ;;  %v455_v56 = vrot.slane %v453_v40, 4  ;;  %v350_v57 = vld [vmem:[%s6007_s30 + $0x3c] sm:$0xe]  ;;  %v351_v58 = vld [vmem:[%s6007_s30 + $0x44] sm:$0x1]  ;;  %v460_v59 = vrot.slane %v6136_v51, 5 }
  0x26   : > { %v4744_v61 = vcombine.low %v2027_v39, %v2030_v53  ;;  %v2034_v62 = vsel %vm6009_vm3, %v4728_v46, %v2033_v47  ;;  %v2035_v63 = vrot.slane %v2033_v47, 4  ;;  %v4486_v1 = vrot.slane %v350_v57, 9  ;;  %v4691_v2 = vld [vmem:[%s6007_s30 + $0x54] sm:$0xe]  ;;  %v6150_v4 = vld [vmem:[%s6007_s30 + $0x58] sm:$0xf] }
  0x27   : > { %v457_v5 = vsel %vm6009_vm3, %v455_v56, %v456_v45  ;;  %v462_v8 = vrot.slane %v460_v59, 4  ;;  %v463_v9 = vrot.slane %v351_v58, 5  ;;  %v4693_v11 = vld [vmem:[%s6007_s30 + $0x5c] sm:$0x1]  ;;  %v4729_v12 = vrot.slane %v4691_v2, 9 }
  0x28   : > { %v4502_v13 = vcombine.low %v454_v55, %v457_v5  ;;  %v2037_v15 = vsel %vm6009_vm3, %v2035_v63, %v2036_v48  ;;  %v461_v16 = vsel %vm6009_vm3, %v4486_v1, %v460_v59  ;;  %v2040_v18 = vrot.slane %v6150_v4, 5  ;;  %v6161_v19 = vld [vmem:[%s6007_s30 + $0x4c] sm:$0xf]  ;;  %v352_v20 = vld [vmem:[%s6007_s30 + $0x48] sm:$0xe]  ;;  %5396 = vmatmul.mubr.msk.bf16.gmra.mrb[4].mxu0 %vm585_vm4, %v4744_v61 }
  0x29   : > { %v4745_v23 = vcombine.low %v2034_v62, %v2037_v15  ;;  %v464_v24 = vsel %vm6009_vm3, %v462_v8, %v463_v9  ;;  %v2043_v25 = vrot.slane %v4693_v11, 5  ;;  %v353_v26 = vld [vmem:[%s6007_s30 + $0x50] sm:$0x1]  ;;  %v4487_v27 = vrot.slane %v352_v20, 9  ;;  %v4694_v28 = vld [vmem:[%s6007_s30 + $0x60] sm:$0xe] }
  0x2a   : > { %5263 = vmatprep.mubr.msk.bf16.mxu1 %vm585_vm4, %v4502_v13  ;;  %v4503_v30 = vcombine.low %v461_v16, %v464_v24  ;;  %v2041_v32 = vsel %vm6009_vm3, %v4729_v12, %v2040_v18  ;;  %v2042_v33 = vrot.slane %v2040_v18, 4  ;;  %v467_v34 = vrot.slane %v6161_v19, 5  ;;  %v6174_v35 = vld [vmem:[%s6007_s30 + $0x64] sm:$0xf]  ;;  %v4696_v36 = vld [vmem:[%s6007_s30 + $0x68] sm:$0x1] }
  0x2b   : > { %5399 = vmatprep.mubr.msk.bf16.mxu0 %vm585_vm4, %v4745_v23  ;;  %v470_v37 = vrot.slane %v353_v26, 5  ;;  %v4730_v38 = vrot.slane %v4694_v28, 9  ;;  %v2047_v39 = vrot.slane %v6174_v35, 5  ;;  %v2050_v42 = vrot.slane %v4696_v36, 5  ;;  %v6180_v40 = vld [vmem:[%s6007_s30 + $0x58] sm:$0xf] }
  0x2c   : > { %v2044_v44 = vsel %vm6009_vm3, %v2042_v33, %v2043_v25  ;;  %v468_v45 = vsel %vm6009_vm3, %v4487_v27, %v467_v34  ;;  %v469_v46 = vrot.slane %v467_v34, 4  ;;  %v354_v47 = vld [vmem:[%s6007_s30 + $0x54] sm:$0xe]  ;;  %v355_v48 = vld [vmem:[%s6007_s30 + $0x5c] sm:$0x1]  ;;  %v474_v53 = vrot.slane %v6180_v40, 5 }
  0x2d   : > { %5264 = vmatmul.mubr.msk.bf16.gmra.mrb[8].mxu1 %vm585_vm4, %v4503_v30  ;;  %v4746_v55 = vcombine.low %v2041_v32, %v2044_v44  ;;  %v2048_v56 = vsel %vm6009_vm3, %v4730_v38, %v2047_v39  ;;  %v2049_v57 = vrot.slane %v2047_v39, 4  ;;  %v4488_v58 = vrot.slane %v354_v47, 9  ;;  %v4697_v59 = vld [vmem:[%s6007_s30 + $0x6c] sm:$0xe]  ;;  %v6194_v61 = vld [vmem:[%s6007_s30 + $0x70] sm:$0xf] }
  0x2e   : > { %v471_v62 = vsel %vm6009_vm3, %v469_v46, %v470_v37  ;;  %v476_v63 = vrot.slane %v474_v53, 4  ;;  %v477_v1 = vrot.slane %v355_v48, 5  ;;  %v4699_v2 = vld [vmem:[%s6007_s30 + $0x74] sm:$0x1]  ;;  %v4731_v5 = vrot.slane %v4697_v59, 9 }
  0x2f   : > { %v4504_v8 = vcombine.low %v468_v45, %v471_v62  ;;  %v2051_v9 = vsel %vm6009_vm3, %v2049_v57, %v2050_v42  ;;  %v475_v11 = vsel %vm6009_vm3, %v4488_v58, %v474_v53  ;;  %v2054_v12 = vrot.slane %v6194_v61, 5  ;;  %v6205_v13 = vld [vmem:[%s6007_s30 + $0x64] sm:$0xf]  ;;  %v356_v15 = vld [vmem:[%s6007_s30 + $0x60] sm:$0xe] }
  0x30   : > { %v4747_v16 = vcombine.low %v2048_v56, %v2051_v9  ;;  %v478_v18 = vsel %vm6009_vm3, %v476_v63, %v477_v1  ;;  %v2057_v20 = vrot.slane %v4699_v2, 5  ;;  %v357_v23 = vld [vmem:[%s6007_s30 + $0x68] sm:$0x1]  ;;  %v4489_v24 = vrot.slane %v356_v15, 9  ;;  %v4773_v25 = vld [vmem:[%s6007_s30 + $0x18] sm:$0xc]  ;;  %5400 = vmatmul.mubr.msk.bf16.gmra.mrb[8].mxu0 %vm585_vm4, %v4746_v55 }
  0x31   : > { %5267 = vmatprep.mubr.msk.bf16.mxu1 %vm585_vm4, %v4504_v8  ;;  %v4505_v27 = vcombine.low %v475_v11, %v478_v18  ;;  %v2055_v28 = vsel %vm6009_vm3, %v4731_v5, %v2054_v12  ;;  %v2056_v30 = vrot.slane %v2054_v12, 4  ;;  %v481_v32 = vrot.slane %v6205_v13, 5  ;;  %v4774_v33 = vld [vmem:[%s6007_s30 + $0x20] sm:$0x3]  ;;  %v6225_v34 = vld [vmem:[%s6007_s30 + $0x70] sm:$0xf] }
  0x32   : > { %5403 = vmatprep.mubr.msk.bf16.mxu0 %vm585_vm4, %v4747_v16  ;;  %v484_v36 = vrot.slane %v357_v23, 5  ;;  %v4805_v37 = vrot.slane %v4773_v25, 10  ;;  %v2478_v38 = vrot.slane %v4774_v33, 6  ;;  %v358_v39 = vld [vmem:[%s6007_s30 + $0x6c] sm:$0xe]  ;;  %v488_v42 = vrot.slane %v6225_v34, 5 }
  0x33   : > { %v2058_v44 = vsel %vm6009_vm3, %v2056_v30, %v2057_v20  ;;  %v482_v45 = vsel %vm6009_vm3, %v4489_v24, %v481_v32  ;;  %v483_v46 = vrot.slane %v481_v32, 4  ;;  %v359_v47 = vld [vmem:[%s6007_s30 + $0x74] sm:$0x1]  ;;  %v4490_v48 = vrot.slane %v358_v39, 9  ;;  %v4775_v53 = vld [vmem:[%s6007_s30 + $0x24] sm:$0xc] }
  0x34   : > { %v4748_v55 = vcombine.low %v2055_v28, %v2058_v44  ;;  %v2476_v56 = vsel %vm6214_vm6, %v4805_v37, %v2475_v22  ;;  %v2479_v57 = vsel %vm6214_vm6, %v6066_v50, %v2478_v38  ;;  %v490_v58 = vrot.slane %v488_v42, 4  ;;  %v4776_v59 = vld [vmem:[%s6007_s30 + $0x2c] sm:$0x3]  ;;  %v6245_v62 = vld [vmem:[%s6007_s30 + $0x7c] sm:$0xf] }
  0x35   : > { %5268 = vmatmul.mubr.msk.bf16.gmra.mrb[12].mxu1 %vm585_vm4, %v4505_v27  ;;  %v485_v63 = vsel %vm6009_vm3, %v483_v46, %v484_v36  ;;  %v4822_v1 = vcombine.low %v2476_v56, %v2479_v57  ;;  %v489_v14 = vsel %vm6009_vm3, %v4490_v48, %v488_v42  ;;  %v491_v22 = vrot.slane %v359_v47, 5  ;;  %v360_v2 = vld [vmem:[%s6007_s30 + $0x78] sm:$0xe]  ;;  %v361_v5 = vld [vmem:[%s6007_s30 + $0x80] sm:$0x1] }
  0x36   : > { %v4506_v8 = vcombine.low %v482_v45, %v485_v63  ;;  %v4806_v50 = vrot.slane %v4775_v53, 10  ;;  %v2485_v9 = vrot.slane %v4776_v59, 6  ;;  %v4491_v11 = vrot.slane %v360_v2, 9  ;;  %v4777_v12 = vld [vmem:[%s6007_s30 + $0x30] sm:$0xc] }
  0x37   : > { %v492_v15 = vsel %vm6009_vm3, %v490_v58, %v491_v22  ;;  %v495_v16 = vrot.slane %v6245_v62, 5  ;;  %v498_v18 = vrot.slane %v361_v5, 5  ;;  %v4778_v20 = vld [vmem:[%s6007_s30 + $0x38] sm:$0x3]  ;;  %v4807_v23 = vrot.slane %v4777_v12, 10 }
  0x38   : > { %5271 = vmatprep.mubr.msk.bf16.mxu1 %vm585_vm4, %v4506_v8  ;;  %v4507_v24 = vcombine.low %v489_v14, %v492_v15  ;;  %v2483_v25 = vsel %vm6214_vm6, %v4806_v50, %v2482_v52  ;;  %v3043_v27 = vsel %vm634_vm0, %v6096_v10, 0  ;;  %v2489_v28 = vrot.slane %v6070_v54, 6  ;;  %v6268_v30 = vld [vmem:[%s6007_s30 + $0x88] sm:$0xf]  ;;  %v362_v32 = vld [vmem:[%s6007_s30 + $0x84] sm:$0xe]  ;;  %5404 = vmatmul.mubr.msk.bf16.gmra.mrb[12].mxu0 %vm585_vm4, %v4748_v55 }
  0x39   : > { %v2486_v33 = vsel %vm6214_vm6, %v6080_v60, %v2485_v9  ;;  %v496_v31 = vsel %vm6009_vm3, %v4491_v11, %v495_v16  ;;  %v497_v52 = vrot.slane %v495_v16, 4  ;;  %v2492_v36 = vrot.slane %v4778_v20, 6  ;;  %v363_v37 = vld [vmem:[%s6007_s30 + $0x8c] sm:$0x1]  ;;  %v4779_v10 = vld [vmem:[%s6007_s30 + $0x3c] sm:$0xc]  ;;  %5425 = vmatprep.mubr.msk.bf16.mxu0 %vm585_vm4, %v4822_v1 }
  0x3a   : > { %v2490_v54 = vsel %vm6214_vm6, %v4807_v23, %v2489_v28  ;;  %v2491_v38 = vrot.slane %v2489_v28, 4  ;;  %v4492_v39 = vrot.slane %v362_v32, 9  ;;  %v502_v42 = vrot.slane %v6268_v30, 5  ;;  %v4780_v60 = vld [vmem:[%s6007_s30 + $0x44] sm:$0x3] }
  0x3b   : > { %v499_v44 = vsel %vm6009_vm3, %v497_v52, %v498_v18  ;;  %v505_v45 = vrot.slane %v363_v37, 5  ;;  %v4808_v46 = vrot.slane %v4779_v10, 10  ;;  %v2496_v47 = vrot.slane %v6102_v17, 6  ;;  %v6288_v48 = vld [vmem:[%s6007_s30 + $0x94] sm:$0xf] }
  0x3c   : > { %v4823_v53 = vcombine.low %v2483_v25, %v2486_v33  ;;  %v4508_v55 = vcombine.low %v496_v31, %v499_v44  ;;  %v2493_v56 = vsel %vm6214_vm6, %v2491_v38, %v2492_v36  ;;  %v504_v57 = vrot.slane %v502_v42, 4  ;;  %v364_v58 = vld [vmem:[%s6007_s30 + $0x90] sm:$0xe]  ;;  %v365_v59 = vld [vmem:[%s6007_s30 + $0x98] sm:$0x1] }
  0x3d   : > { %5272 = vmatmul.mubr.msk.bf16.gmra.mrb[16].mxu1 %vm585_vm4, %v4507_v24  ;;  %v4824_v63 = vcombine.low %v2490_v54, %v2493_v56  ;;  %v503_v1 = vsel %vm6009_vm3, %v4492_v39, %v502_v42  ;;  %v2498_v17 = vrot.slane %v2496_v47, 4  ;;  %v2499_v14 = vrot.slane %v4780_v60, 6  ;;  %v4781_v22 = vld [vmem:[%s6007_s30 + $0x48] sm:$0xc]  ;;  %v4782_v2 = vld [vmem:[%s6007_s30 + $0x50] sm:$0x3] }
  0x3e   : > { %5275 = vmatprep.mubr.msk.bf16.mxu1 %vm585_vm4, %v4508_v55  ;;  %v506_v5 = vsel %vm6009_vm3, %v504_v57, %v505_v45  ;;  %v4493_v8 = vrot.slane %v364_v58, 9  ;;  %v509_v50 = vrot.slane %v6288_v48, 5  ;;  %v512_v9 = vrot.slane %v365_v59, 5  ;;  %v6304_v11 = vld [vmem:[%s6007_s30 + $0xa0] sm:$0xf] }
  0x3f   : > { %v2497_v12 = vsel %vm6214_vm6, %v4808_v46, %v2496_v47  ;;  %v4809_v15 = vrot.slane %v4781_v22, 10  ;;  %v2503_v16 = vrot.slane %v6128_v43, 6  ;;  %v366_v18 = vld [vmem:[%s6007_s30 + $0x9c] sm:$0xe]  ;;  %v367_v20 = vld [vmem:[%s6007_s30 + $0xa4] sm:$0x1]  ;;  %v4509_v23 = vcombine.low %v503_v1, %v506_v5 }
  0x40   : > { %v510_v24 = vsel %vm6009_vm3, %v4493_v8, %v509_v50  ;;  %v511_v25 = vrot.slane %v509_v50, 4  ;;  %v2506_v28 = vrot.slane %v4782_v2, 6  ;;  %v4783_v32 = vld [vmem:[%s6007_s30 + $0x54] sm:$0xc]  ;;  %v6317_v33 = vld [vmem:[%s7260_s1 + $0xe] sm:$0x3]  ;;  %5426 = vmatmul.mubr.msk.bf16.vlgmr.msra.gmra.mrb[0].mxu0 %vm585_vm4, %v4823_v53  ;;  %v2500_v43 = vsel %vm6214_vm6, %v2498_v17, %v2499_v14 }
  0x41   : > { %v2505_v31 = vrot.slane %v2503_v16, 4  ;;  %v4494_v52 = vrot.slane %v366_v18, 9  ;;  %v516_v36 = vrot.slane %v6304_v11, 5  ;;  %v4784_v37 = vld [vmem:[%s6007_s30 + $0x5c] sm:$0x3]  ;;  %5458 = vmatpush3.bf16.msra.mxu0 %v3043_v27  ;;  %5429 = vmatprep.mubr.msk.bf16.mxu0 %vm585_vm4, %v4824_v63  ;;  %v519_v54 = vrot.slane %v367_v20, 5 }
  0x42   : > { %v513_v10 = vsel %vm6009_vm3, %v511_v25, %v512_v9  ;;  %v2510_v38 = vrot.slane %v6150_v4, 6  ;;  %v6329_v39 = vld [vmem:[%s6007_s30 + $0xac] sm:$0xf]  ;;  %v368_v42 = vld [vmem:[%s6007_s30 + $0xa8] sm:$0xe]  ;;  %v2504_v44 = vsel %vm6214_vm6, %v4809_v15, %v2503_v16  ;;  %5825 = vmatprep.subr.msk.bf16.mxu0 %vm634_vm0, %v6317_v33  ;;  %v4825_v47 = vcombine.low %v2497_v12, %v2500_v43 }
  0x43   : > { %v4510_v60 = vcombine.low %v510_v24, %v513_v10  ;;  %v2507_v27 = vsel %vm6214_vm6, %v2505_v31, %v2506_v28  ;;  %v518_v45 = vrot.slane %v516_v36, 4  ;;  %v369_v46 = vld [vmem:[%s6007_s30 + $0xb0] sm:$0x1]  ;;  %v4810_v53 = vrot.slane %v4783_v32, 10  ;;  %v4785_v55 = vld [vmem:[%s6007_s30 + $0x60] sm:$0xc] }
  0x44   : > { %v2512_v4 = vrot.slane %v2510_v38, 4  ;;  %v4786_v56 = vld [vmem:[%s6007_s30 + $0x68] sm:$0x3]  ;;  %v2513_v57 = vrot.slane %v4784_v37, 6  ;;  %v4495_v58 = vrot.slane %v368_v42, 9  ;;  %v523_v59 = vrot.slane %v6329_v39, 5 }
  0x45   : > { %5276 = vmatmul.mubr.msk.bf16.gmra.mrb[20].mxu1 %vm585_vm4, %v4509_v23  ;;  %v526_v63 = vrot.slane %v369_v46, 5  ;;  %v6344_v1 = vld [vmem:[%s6007_s30 + $0xb8] sm:$0xf]  ;;  %v4826_v17 = vcombine.low %v2504_v44, %v2507_v27  ;;  %v517_v14 = vsel %vm6009_vm3, %v4494_v52, %v516_v36  ;;  %v520_v22 = vsel %vm6009_vm3, %v518_v45, %v519_v54  ;;  %v370_v5 = vld [vmem:[%s6007_s30 + $0xb4] sm:$0xe] }
  0x46   : > { %5279 = vmatprep.mubr.msk.bf16.mxu1 %vm585_vm4, %v4510_v60  ;;  %v2517_v2 = vrot.slane %v6174_v35, 6  ;;  %v524_v8 = vsel %vm6009_vm3, %v4495_v58, %v523_v59  ;;  %v525_v50 = vrot.slane %v523_v59, 4  ;;  %v4811_v9 = vrot.slane %v4785_v55, 10  ;;  %v371_v15 = vld [vmem:[%s6007_s30 + $0xbc] sm:$0x1] }
  0x47   : > { %v2520_v12 = vrot.slane %v4786_v56, 6  ;;  %v2511_v16 = vsel %vm6214_vm6, %v4810_v53, %v2510_v38  ;;  %v530_v20 = vrot.slane %v6344_v1, 5  ;;  %v4511_v35 = vcombine.low %v517_v14, %v520_v22  ;;  %v4701_v28 = vld [vmem:[%s6007_s30 + $0x7c] sm:$0xf]  ;;  %v4787_v52 = vld [vmem:[%s6007_s30 + $0x6c] sm:$0xc] }
  0x48   : > { %v2519_v18 = vrot.slane %v2517_v2, 4  ;;  %5430 = vmatmul.mubr.msk.bf16.gmra.mrb[4].mxu0 %vm585_vm4, %v4825_v47  ;;  %v2514_v23 = vsel %vm6214_vm6, %v2512_v4, %v2513_v57  ;;  %v527_v24 = vsel %vm6009_vm3, %v525_v50, %v526_v63  ;;  %v4496_v25 = vrot.slane %v370_v5, 9  ;;  %v4788_v54 = vld [vmem:[%s6007_s30 + $0x74] sm:$0x3]  ;;  %v4789_v38 = vld [vmem:[%s6007_s30 + $0x78] sm:$0xc] }
  0x49   : > { %5433 = vmatprep.mubr.msk.bf16.mxu0 %vm585_vm4, %v4826_v17  ;;  %v4512_v32 = vcombine.low %v524_v8, %v527_v24  ;;  %v532_v43 = vrot.slane %v530_v20, 4  ;;  %v533_v31 = vrot.slane %v371_v15, 5  ;;  %v2524_v36 = vrot.slane %v6194_v61, 6  ;;  %v4790_v42 = vld [vmem:[%s6007_s30 + $0x80] sm:$0x3] }
  0x4a   : > { %v2518_v37 = vsel %vm6214_vm6, %v4811_v9, %v2517_v2  ;;  %v2521_v10 = vsel %vm6214_vm6, %v2519_v18, %v2520_v12  ;;  %v2531_v60 = vrot.slane %v4701_v28, 6  ;;  %v4827_v44 = vcombine.low %v2511_v16, %v2514_v23  ;;  %v307_v4 = vld [vmem:[%s6007_s30] sm:$0xf]  ;;  %v4704_v58 = vld [vmem:[%s6007_s30 + $0x88] sm:$0xf] }
  0x4b   : > { %v531_v27 = vsel %vm6009_vm3, %v4496_v25, %v530_v20  ;;  %v4812_v61 = vrot.slane %v4787_v52, 10  ;;  %v4828_v45 = vcombine.low %v2518_v37, %v2521_v10  ;;  %v534_v46 = vsel %vm6009_vm3, %v532_v43, %v533_v31  ;;  %v4707_v59 = vld [vmem:[%s6007_s30 + $0x94] sm:$0xf]  ;;  %v4791_v50 = vld [vmem:[%s6007_s30 + $0x84] sm:$0xc] }
  0x4c   : > { %v2526_v47 = vrot.slane %v2524_v36, 4  ;;  %v2527_v53 = vrot.slane %v4788_v54, 6  ;;  %v4813_v55 = vrot.slane %v4789_v38, 10  ;;  %v2533_v56 = vrot.slane %v2531_v60, 4  ;;  %v4792_v9 = vld [vmem:[%s6007_s30 + $0x8c] sm:$0x3] }
  0x4d   : > { %5280 = vmatmul.mubr.msk.bf16.gmra.mrb[24].mxu1 %vm585_vm4, %v4511_v35  ;;  %v2534_v57 = vrot.slane %v4790_v42, 6  ;;  %v4513_v63 = vcombine.low %v531_v27, %v534_v46  ;;  %v2525_v17 = vsel %vm6214_vm6, %v4812_v61, %v2524_v36  ;;  %v4530_v22 = vcombine.low %v307_v4, %v6014_v7  ;;  %v4793_v15 = vld [vmem:[%s6007_s30 + $0x90] sm:$0xc]  ;;  %v4794_v16 = vld [vmem:[%s6007_s30 + $0x98] sm:$0x3] }
  0x4e   : > { %5283 = vmatprep.mubr.msk.bf16.mxu1 %vm585_vm4, %v4512_v32  ;;  %v2528_v14 = vsel %vm6214_vm6, %v2526_v47, %v2527_v53  ;;  %v2538_v2 = vrot.slane %v4704_v58, 6  ;;  %v2532_v5 = vsel %vm6214_vm6, %v4813_v55, %v2531_v60  ;;  %v2545_v12 = vrot.slane %v4707_v59, 6  ;;  %v309_v7 = vld [vmem:[%s6007_s30 + $0xc] sm:$0xf]  ;;  %v311_v25 = vld [vmem:[%s6007_s30 + $0x18] sm:$0xf] }
  0x4f   : > { %v2535_v8 = vsel %vm6214_vm6, %v2533_v56, %v2534_v57  ;;  %v4829_v18 = vcombine.low %v2525_v17, %v2528_v14  ;;  %v4814_v35 = vrot.slane %v4791_v50, 10  ;;  %v2541_v24 = vrot.slane %v4792_v9, 6  ;;  %v4710_v31 = vld [vmem:[%s6007_s30 + $0xa0] sm:$0xf]  ;;  %v4713_v52 = vld [vmem:[%s6007_s30 + $0xac] sm:$0xf] }
  0x50   : > { %5434 = vmatmul.mubr.msk.bf16.gmra.mrb[8].mxu0 %vm585_vm4, %v4827_v44  ;;  %v4830_v20 = vcombine.low %v2532_v5, %v2535_v8  ;;  %v2540_v23 = vrot.slane %v2538_v2, 4  ;;  %v4815_v28 = vrot.slane %v4793_v15, 10  ;;  %v2547_v32 = vrot.slane %v2545_v12, 4  ;;  %v4795_v37 = vld [vmem:[%s6007_s30 + $0x9c] sm:$0xc] }
  0x51   : > { %5437 = vmatprep.mubr.msk.bf16.mxu0 %vm585_vm4, %v4828_v45  ;;  %v2548_v43 = vrot.slane %v4794_v16, 6  ;;  %v4531_v36 = vcombine.low %v309_v7, %v6028_v21  ;;  %v4796_v10 = vld [vmem:[%s6007_s30 + $0xa4] sm:$0x3]  ;;  %v2539_v54 = vsel %vm6214_vm6, %v4814_v35, %v2538_v2  ;;  %v4532_v42 = vcombine.low %v311_v25, %v6050_v41  ;;  %v4797_v61 = vld [vmem:[%s6007_s30 + $0xa8] sm:$0xc] }
  0x52   : > { %v2542_v38 = vsel %vm6214_vm6, %v2540_v23, %v2541_v24  ;;  %v2552_v60 = vrot.slane %v4710_v31, 6  ;;  %v1353_v44 = vsel %vm634_vm0, %v6062_v49, 0  ;;  %v2546_v21 = vsel %vm6214_vm6, %v4815_v28, %v2545_v12  ;;  %v313_v46 = vld [vmem:[%s6007_s30 + $0x24] sm:$0xf]  ;;  %v4798_v47 = vld [vmem:[%s6007_s30 + $0xb0] sm:$0x3] }
  0x53   : > { %v2549_v27 = vsel %vm6214_vm6, %v2547_v32, %v2548_v43  ;;  %v2559_v45 = vrot.slane %v4713_v52, 6  ;;  %v4831_v53 = vcombine.low %v2539_v54, %v2542_v38  ;;  %v4816_v41 = vrot.slane %v4795_v37, 10  ;;  %v315_v55 = vld [vmem:[%s6007_s30 + $0x30] sm:$0xf]  ;;  %v4716_v49 = vld [vmem:[%s6007_s30 + $0xb8] sm:$0xf] }
  0x54   : > { %v2555_v4 = vrot.slane %v4796_v10, 6  ;;  %v4832_v56 = vcombine.low %v2546_v21, %v2549_v27  ;;  %v2554_v57 = vrot.slane %v2552_v60, 4  ;;  %v4817_v58 = vrot.slane %v4797_v61, 10  ;;  %v4799_v17 = vld [vmem:[%s6007_s30 + $0xb4] sm:$0xc] }
  0x55   : > { %5284 = vmatmul.mubr.msk.bf16.gmra.mrb[28].mxu1 %vm585_vm4, %v4513_v63  ;;  %v2561_v59 = vrot.slane %v2559_v45, 4  ;;  %v2562_v63 = vrot.slane %v4798_v47, 6  ;;  %v4719_v14 = vld [vmem:[%s6007_s30 + $0xc4] sm:$0xf]  ;;  %v4800_v2 = vld [vmem:[%s6007_s30 + $0xbc] sm:$0x3]  ;;  %v2553_v5 = vsel %vm6214_vm6, %v4816_v41, %v2552_v60  ;;  %v4534_v50 = vcombine.low %v315_v55, %v6116_v29 }
  0x56   : > { %5289 = vmatprep.mubr.msk.bf16.mxu1 %vm585_vm4, %v4530_v22  ;;  %v4533_v22 = vcombine.low %v313_v46, %v6084_v0  ;;  %v2556_v8 = vsel %vm6214_vm6, %v2554_v57, %v2555_v4  ;;  %v2566_v9 = vrot.slane %v4716_v49, 6  ;;  %v2560_v12 = vsel %vm6214_vm6, %v4817_v58, %v2559_v45  ;;  %v4801_v0 = vld [vmem:[%s6007_s30 + $0xc0] sm:$0xc]  ;;  %v317_v7 = vld [vmem:[%s6007_s30 + $0x3c] sm:$0xf] }
  0x57   : > { %v2563_v15 = vsel %vm6214_vm6, %v2561_v59, %v2562_v63  ;;  %v2573_v16 = vrot.slane %v4719_v14, 6  ;;  %v4833_v35 = vcombine.low %v2553_v5, %v2556_v8  ;;  %v4818_v23 = vrot.slane %v4799_v17, 10  ;;  %v319_v24 = vld [vmem:[%s6007_s30 + $0x48] sm:$0xf]  ;;  %v4803_v21 = vld [vmem:[%s6007_s30 + $0xcc] sm:$0xc] }
  0x58   : > { %5438 = vmatmul.mubr.msk.bf16.gmra.mrb[12].mxu0 %vm585_vm4, %v4829_v18  ;;  %v6447_v18 = vld [vmem:[%s7260_s1 + $0x6] sm:$0x3]  ;;  %v4834_v25 = vcombine.low %v2560_v12, %v2563_v15  ;;  %v2568_v28 = vrot.slane %v2566_v9, 4  ;;  %v2569_v32 = vrot.slane %v4800_v2, 6  ;;  %v4819_v43 = vrot.slane %v4801_v0, 10  ;;  %v5861_v59 = vld [vmem:[%s6007_s30 + $0x30] sm:$0xff]  }
  0x59   : > { %5441 = vmatprep.mubr.msk.bf16.mxu0 %vm585_vm4, %v4830_v20  ;;  %v4802_v20 = vld [vmem:[%s6007_s30 + $0xc8] sm:$0x3]  ;;  %v2575_v31 = vrot.slane %v2573_v16, 4  ;;  %v4535_v37 = vcombine.low %v317_v7, %v6136_v51  ;;  %v2567_v10 = vsel %vm6214_vm6, %v4818_v23, %v2566_v9  ;;  %v4536_v38 = vcombine.low %v319_v24, %v6161_v19  ;;  %v4804_v27 = vld [vmem:[%s6007_s30 + $0xd4] sm:$0x3]  ;;  %v5863_v2 = vld [vmem:[%s6007_s30 + $0x3c] sm:$0xff]  }
  0x5a   : > { %v2576_v52 = vrot.slane %v4802_v20, 6  ;;  %v2570_v54 = vsel %vm6214_vm6, %v2568_v28, %v2569_v32  ;;  %v2574_v60 = vsel %vm6214_vm6, %v4819_v43, %v2573_v16  ;;  %v321_v45 = vld [vmem:[%s6007_s30 + $0x54] sm:$0xf]  ;;  %v4820_v47 = vrot.slane %v4803_v21, 10  ;;  %v323_v4 = vld [vmem:[%s6007_s30 + $0x60] sm:$0xf] }
  0x5b   : > { %v4835_v61 = vcombine.low %v2567_v10, %v2570_v54  ;;  %v2583_v41 = vrot.slane %v4804_v27, 6  ;;  %v4537_v55 = vcombine.low %v321_v45, %v6180_v40  ;;  %v4538_v57 = vcombine.low %v323_v4, %v6205_v13  ;;  %v325_v63 = vld [vmem:[%s6007_s30 + $0x6c] sm:$0xf]  ;;  %v327_v17 = vld [vmem:[%s6007_s30 + $0x78] sm:$0xf]  ;;  %v5869_v16 = vld [vmem:[%s6007_s30 + $0x60] sm:$0xff]  }
  0x5c   : > { %v4539_v14 = vcombine.low %v325_v63, %v6225_v34  ;;  %v5865_v5 = vld [vmem:[%s6007_s30 + $0x48] sm:$0xff]   ;;  %v329_v8 = vld [vmem:[%s6007_s30 + $0x84] sm:$0xf]  ;;  %v331_v9 = vld [vmem:[%s6007_s30 + $0x90] sm:$0xf] }
  0x5d   : > { %5290 = vmatmul.mubr.msk.bf16.vlgmr.msra.gmra.mrb[0].mxu1 %vm585_vm4, %v4531_v36  ;;  %v4722_v36 = vld [vmem:[%s6007_s30 + $0xd0] sm:$0xf]  ;;  %v4541_v15 = vcombine.low %v329_v8, %v6268_v30  ;;  %v4542_v0 = vcombine.low %v331_v9, %v6288_v48  ;;  %v333_v7 = vld [vmem:[%s6007_s30 + $0x9c] sm:$0xf]  ;;  %v5900_v20 = vld [vmem:[%s6007_s30 + $0x4] sm:$0xf] }
  0x5e   : > { %5322 = vmatpush3.bf16.msra.mxu1 %v1353_v44  ;;  %5293 = vmatprep.mubr.msk.bf16.mxu1 %vm585_vm4, %v4532_v42  ;;  %v2580_v42 = vrot.slane %v4722_v36, 6  ;;  %v2577_v44 = vsel %vm6214_vm6, %v2575_v31, %v2576_v52  ;;  %v6503_v12 = vld [vmem:[%s7260_s1 + $0x10] sm:$0x3]  ;;  %v335_v23 = vld [vmem:[%s6007_s30 + $0xa8] sm:$0xf]  ;;  %v4543_v28 = vcombine.low %v333_v7, %v6304_v11  ;;  %v5873_v54 = vld [vmem:[%s6007_s30 + $0x78] sm:$0xff]  }
  0x5f   : > { %5820 = vmatprep.subr.msk.bf16.mxu1 %vm634_vm0, %v6447_v18  ;;  %v4836_v46 = vcombine.low %v2574_v60, %v2577_v44  ;;  %v1075_v24 = vld [vmem:[%s6007_s30] sm:$0xc]  ;;  %v4544_v32 = vcombine.low %v335_v23, %v6329_v39  ;;  %v5901_v36 = vld [vmem:[%s6007_s30 + $0x10] sm:$0xf]  ;;  %v1078_v60 = vld [vmem:[%s6007_s30 + $0x14] sm:$0x3] }
  0x60   : > { %5442 = vmatmul.mubr.msk.bf16.gmra.mrb[16].mxu0 %vm585_vm4, %v4831_v53  ;;  %v2582_v53 = vrot.slane %v2580_v42, 4  ;;  %v2581_v49 = vsel %vm6214_vm6, %v4820_v47, %v2580_v42  ;;  %v4562_v43 = vrot.slane %v1075_v24, 10  ;;  %v5871_v10 = vld [vmem:[%s6007_s30 + $0x6c] sm:$0xff]   ;;  %v5902_v27 = vld [vmem:[%s6007_s30 + $0x1c] sm:$0xf]  ;;  %v1172_v9 = vrot.slane %v6116_v29, 6 }
  0x61   : > { %5445 = vmatprep.mubr.msk.bf16.mxu0 %vm585_vm4, %v4832_v56  ;;  %v1077_v42 = vld [vmem:[%s6007_s30 + $0xc] sm:$0xc]  ;;  %v1079_v45 = vld [vmem:[%s6007_s30 + $0x18] sm:$0xc]  ;;  %v1712_v23 = vsel %vm634_vm0, %v6447_v18, 0  ;;  %v1179_v18 = vrot.slane %v6136_v51, 6 }
  0x62   : > { %v2584_v56 = vsel %vm6214_vm6, %v2582_v53, %v2583_v41  ;;  %v4563_v4 = vrot.slane %v1077_v42, 10  ;;  %v1174_v29 = vrot.slane %v1172_v9, 4  ;;  %v5904_v42 = vld [vmem:[%s7260_s1 + $0x8] sm:$0x3]  ;;  %v1088_v51 = vld [vmem:[%s6007_s30 + $0x50] sm:$0x3] }
  0x63   : > { %v4837_v58 = vcombine.low %v2581_v49, %v2584_v56  ;;  %v4564_v49 = vrot.slane %v1079_v45, 10 }
  0x65   : > { %5294 = vmatmul.mubr.msk.bf16.gmra.mrb[4].mxu1 %vm585_vm4, %v4533_v22  ;;  %v4540_v22 = vcombine.low %v327_v17, %v6245_v62 }
  0x66   : > { %5297 = vmatprep.mubr.msk.bf16.mxu1 %vm585_vm4, %v4534_v50  ;;  %v3545_v50 = vsel %vm634_vm0, %v6317_v33, 0  ;;  %v5867_v33 = vld [vmem:[%s6007_s30 + $0x54] sm:$0xff]  }
  0x68   : > { %5446 = vmatmul.mubr.msk.bf16.gmra.mrb[20].mxu0 %vm585_vm4, %v4833_v35  ;;  %v1144_v35 = vrot.slane %v5900_v20, 6 }
  0x69   : > { %5449 = vmatprep.mubr.msk.bf16.mxu0 %vm585_vm4, %v4834_v25  ;;  %v1076_v25 = vld [vmem:[%s6007_s30 + $0x8] sm:$0x3] }
  0x6a   : > { %v1146_v31 = vrot.slane %v1144_v35, 4  ;;  %v1147_v52 = vrot.slane %v1076_v25, 6  ;;  %v1145_v44 = vsel %vm6214_vm6, %v4562_v43, %v1144_v35  ;;  %v5878_v43 = vld [vmem:[%s6007_s30 + $0xa8] sm:$0xff]  }
  0x6c   : > { %v1148_v21 = vsel %vm6214_vm6, %v1146_v31, %v1147_v52 }
  0x6d   : > { %5298 = vmatmul.mubr.msk.bf16.gmra.mrb[8].mxu1 %vm585_vm4, %v4535_v37  ;;  %v1151_v37 = vrot.slane %v5901_v36, 6  ;;  %v4579_v41 = vcombine.low %v1145_v44, %v1148_v21 }
  0x6e   : > { %5301 = vmatprep.mubr.msk.bf16.mxu1 %vm585_vm4, %v4536_v38  ;;  %v337_v38 = vld [vmem:[%s6007_s30 + $0xb4] sm:$0xf] }
  0x6f   : > { %v1153_v47 = vrot.slane %v1151_v37, 4  ;;  %v4545_v53 = vcombine.low %v337_v38, %v6344_v1  ;;  %v1152_v63 = vsel %vm6214_vm6, %v4563_v4, %v1151_v37  ;;  %v1186_v38 = vrot.slane %v6161_v19, 6 }
  0x70   : > { %5450 = vmatmul.mubr.msk.bf16.gmra.mrb[24].mxu0 %vm585_vm4, %v4835_v61  ;;  %v1158_v61 = vrot.slane %v5902_v27, 6  ;;  %v1181_v27 = vrot.slane %v1179_v18, 4  ;;  %v1193_v4 = vrot.slane %v6180_v40, 6  ;;  %v1200_v40 = vrot.slane %v6205_v13, 6 }
  0x71   : > { %5453 = vmatprep.mubr.msk.bf16.mxu0 %vm585_vm4, %v4836_v46  ;;  %v1080_v46 = vld [vmem:[%s6007_s30 + $0x20] sm:$0x3]  ;;  %v1188_v45 = vrot.slane %v1186_v38, 4 }
  0x72   : > { %v1160_v56 = vrot.slane %v1158_v61, 4  ;;  %v1159_v8 = vsel %vm6214_vm6, %v4564_v49, %v1158_v61  ;;  %v1202_v13 = vrot.slane %v1200_v40, 4 }
  0x75   : > { %5302 = vmatmul.mubr.msk.bf16.gmra.mrb[12].mxu1 %vm585_vm4, %v4537_v55  ;;  %v1154_v55 = vrot.slane %v1078_v60, 6 }
  0x76   : > { %5305 = vmatprep.mubr.msk.bf16.mxu1 %vm585_vm4, %v4538_v57  ;;  %v1161_v57 = vrot.slane %v1080_v46, 6  ;;  %v1189_v46 = vrot.slane %v1088_v51, 6  ;;  %v4922_v51 = vld [vmem:[%s6007_s30 + $0x3c] sm:$0xe] }
  0x77   : > { %v1155_v17 = vsel %vm6214_vm6, %v1153_v47, %v1154_v55  ;;  %v5879_v47 = vld [vmem:[%s6007_s30 + $0xb4] sm:$0xff]  }
  0x78   : > { %5454 = vmatmul.mubr.msk.bf16.gmra.mrb[28].mxu0 %vm585_vm4, %v4837_v58  ;;  %v5875_v58 = vld [vmem:[%s6007_s30 + $0x84] sm:$0xff]  }
  0x79   : > { %5459 = vmatprep.mubr.msk.bf16.mxu0 %vm585_vm4, %v5861_v59  ;;  %v5876_v59 = vld [vmem:[%s6007_s30 + $0x90] sm:$0xff]  }
  0x7d   : > { %5306 = vmatmul.mubr.msk.bf16.gmra.mrb[16].mxu1 %vm585_vm4, %v4539_v14  ;;  %v1081_v14 = vld [vmem:[%s6007_s30 + $0x24] sm:$0xc] }
  0x7e   : > { %5309 = vmatprep.mubr.msk.bf16.mxu1 %vm585_vm4, %v4540_v22  ;;  %v1082_v22 = vld [vmem:[%s6007_s30 + $0x2c] sm:$0x3]  ;;  %v4565_v7 = vrot.slane %v1081_v14, 10 }
  0x7f   : > { %v1168_v35 = vrot.slane %v1082_v22, 6 }
  0x80   : > { %5460 = vmatmul.mubr.msk.bf16.vlgmr.msra.gmra.mrb[0].mxu0 %vm585_vm4, %v5863_v2  ;;  %v5903_v2 = vld [vmem:[%s6007_s30 + $0x28] sm:$0xf] }
  0x81   : > { %5492 = vmatpush3.bf16.msra.mxu0 %v3545_v50  ;;  %5463 = vmatprep.mubr.msk.bf16.mxu0 %vm585_vm4, %v5865_v5  ;;  %v1165_v5 = vrot.slane %v5903_v2, 6  ;;  %v1162_v50 = vsel %vm6214_vm6, %v1160_v56, %v1161_v57  ;;  %v1090_v56 = vld [vmem:[%s6007_s30 + $0x5c] sm:$0x3]  ;;  %v1195_v2 = vrot.slane %v1193_v4, 4 }
  0x82   : > { %5826 = vmatprep.subr.msk.bf16.mxu0 %vm634_vm0, %v6503_v12 }
  0x83   : > { %v1167_v20 = vrot.slane %v1165_v5, 4  ;;  %v1166_v31 = vsel %vm6214_vm6, %v4565_v7, %v1165_v5  ;;  %v1196_v5 = vrot.slane %v1090_v56, 6  ;;  %v1093_v7 = vld [vmem:[%s6007_s30 + $0x6c] sm:$0xc] }
  0x85   : > { %5310 = vmatmul.mubr.msk.bf16.gmra.mrb[20].mxu1 %vm585_vm4, %v4541_v15  ;;  %v1083_v15 = vld [vmem:[%s6007_s30 + $0x30] sm:$0xc]  ;;  %v1169_v52 = vsel %vm6214_vm6, %v1167_v20, %v1168_v35  ;;  %v5882_v20 = vld [vmem:[%s6007_s30 + $0xd8] sm:$0xff]  }
  0x86   : > { %5313 = vmatprep.mubr.msk.bf16.mxu1 %vm585_vm4, %v4542_v0  ;;  %v1084_v0 = vld [vmem:[%s6007_s30 + $0x38] sm:$0x3]  ;;  %v4566_v24 = vrot.slane %v1083_v15, 10  ;;  %v4582_v60 = vcombine.low %v1166_v31, %v1169_v52  ;;  %v1214_v31 = vrot.slane %v6245_v62, 6 }
  0x87   : > { %v1175_v25 = vrot.slane %v1084_v0, 6  ;;  %v4919_v0 = vld [vmem:[%s6007_s30 + $0x30] sm:$0xe] }
  0x88   : > { %5464 = vmatmul.mubr.msk.bf16.gmra.mrb[4].mxu0 %vm585_vm4, %v5867_v33  ;;  %v4580_v33 = vcombine.low %v1152_v63, %v1155_v17  ;;  %v1173_v36 = vsel %vm6214_vm6, %v4566_v24, %v1172_v9  ;;  %v6606_v63 = vld [vmem:[%s6007_s30 + $0x34] sm:$0xf]  ;;  %v1092_v17 = vld [vmem:[%s6007_s30 + $0x68] sm:$0x3]  ;;  %v1207_v24 = vrot.slane %v6225_v34, 6 }
  0x89   : > { %5467 = vmatprep.mubr.msk.bf16.mxu0 %vm585_vm4, %v5869_v16  ;;  %v4581_v16 = vcombine.low %v1159_v8, %v1162_v50  ;;  %v1176_v37 = vsel %vm6214_vm6, %v1174_v29, %v1175_v25  ;;  %v3336_v9 = vrot.slane %v6606_v63, 5  ;;  %v1203_v15 = vrot.slane %v1092_v17, 6  ;;  %v6624_v29 = vld [vmem:[%s6007_s30 + $0x40] sm:$0xf]  ;;  %v6634_v34 = vld [vmem:[%s6007_s30 + $0x4c] sm:$0xf] }
  0x8a   : > { %v4583_v21 = vcombine.low %v1173_v36, %v1176_v37  ;;  %v4967_v25 = vrot.slane %v4919_v0, 9  ;;  %v4571_v36 = vrot.slane %v1093_v7, 10  ;;  %v3343_v37 = vrot.slane %v6624_v29, 5  ;;  %v1100_v7 = vld [vmem:[%s6007_s30 + $0x98] sm:$0x3] }
  0x8c   : > { %v1208_v56 = vsel %vm6214_vm6, %v4571_v36, %v1207_v24  ;;  %v4931_v36 = vld [vmem:[%s6007_s30 + $0x60] sm:$0xe] }
  0x8d   : > { %5314 = vmatmul.mubr.msk.bf16.gmra.mrb[24].mxu1 %vm585_vm4, %v4543_v28  ;;  %v5877_v28 = vld [vmem:[%s6007_s30 + $0x9c] sm:$0xff]  }
  0x8e   : > { %5317 = vmatprep.mubr.msk.bf16.mxu1 %vm585_vm4, %v4544_v32  ;;  %v1085_v32 = vld [vmem:[%s6007_s30 + $0x3c] sm:$0xc] }
  0x8f   : > { %v4567_v44 = vrot.slane %v1085_v32, 10 }
  0x90   : > { %5468 = vmatmul.mubr.msk.bf16.gmra.mrb[8].mxu0 %vm585_vm4, %v5871_v10  ;;  %v1086_v10 = vld [vmem:[%s6007_s30 + $0x44] sm:$0x3] }
  0x91   : > { %5471 = vmatprep.mubr.msk.bf16.mxu0 %vm585_vm4, %v5873_v54  ;;  %v1087_v54 = vld [vmem:[%s6007_s30 + $0x48] sm:$0xc]  ;;  %v1182_v19 = vrot.slane %v1086_v10, 6  ;;  %v1180_v55 = vsel %vm6214_vm6, %v4567_v44, %v1179_v18  ;;  %v1204_v18 = vsel %vm6214_vm6, %v1202_v13, %v1203_v15  ;;  %v1095_v10 = vld [vmem:[%s6007_s30 + $0x78] sm:$0xc]  ;;  %v1228_v13 = vrot.slane %v6288_v48, 6 }
  0x92   : > { %v4568_v61 = vrot.slane %v1087_v54, 10  ;;  %v1096_v54 = vld [vmem:[%s6007_s30 + $0x80] sm:$0x3] }
  0x93   : > { %v1183_v49 = vsel %vm6214_vm6, %v1181_v27, %v1182_v19  ;;  %v4925_v27 = vld [vmem:[%s6007_s30 + $0x48] sm:$0xe]  ;;  %v3350_v19 = vrot.slane %v6634_v34, 5 }
  0x94   : > { %v1187_v57 = vsel %vm6214_vm6, %v4568_v61, %v1186_v38  ;;  %v4584_v14 = vcombine.low %v1180_v55, %v1183_v49  ;;  %v5883_v49 = vld [vmem:[%s6007_s30 + $0xe4] sm:$0xff]  }
  0x95   : > { %5318 = vmatmul.mubr.msk.bf16.gmra.mrb[28].mxu1 %vm585_vm4, %v4545_v53  ;;  %v5880_v53 = vld [vmem:[%s6007_s30 + $0xc0] sm:$0xff]  }
  0x96   : > { %5323 = vmatprep.mubr.msk.bf16.mxu1 %vm585_vm4, %v4579_v41  ;;  %v1089_v41 = vld [vmem:[%s6007_s30 + $0x54] sm:$0xc] }
  0x97   : > { %v4569_v22 = vrot.slane %v1089_v41, 10  ;;  %v4968_v41 = vrot.slane %v4922_v51, 9 }
  0x98   : > { %5472 = vmatmul.mubr.msk.bf16.gmra.mrb[12].mxu0 %vm585_vm4, %v5875_v58  ;;  %v1190_v58 = vsel %vm6214_vm6, %v1188_v45, %v1189_v46  ;;  %v4572_v45 = vrot.slane %v1095_v10, 10  ;;  %v1216_v46 = vrot.slane %v1214_v31, 4 }
  0x99   : > { %5475 = vmatprep.mubr.msk.bf16.mxu0 %vm585_vm4, %v5876_v59  ;;  %v1091_v59 = vld [vmem:[%s6007_s30 + $0x60] sm:$0xc]  ;;  %v4585_v8 = vcombine.low %v1187_v57, %v1190_v58  ;;  %v1194_v35 = vsel %vm6214_vm6, %v4569_v22, %v1193_v4  ;;  %v3345_v4 = vrot.slane %v3343_v37, 4  ;;  %v4969_v58 = vrot.slane %v4925_v27, 9 }
  0x9a   : > { %v4570_v50 = vrot.slane %v1091_v59, 10  ;;  %v1097_v59 = vld [vmem:[%s6007_s30 + $0x84] sm:$0xc]  ;;  %v3344_v0 = vsel %vm6009_vm3, %v4968_v41, %v3343_v37  ;;  %v4933_v37 = vld [vmem:[%s6007_s30 + $0x68] sm:$0x1]  ;;  %v4971_v27 = vrot.slane %v4931_v36, 9 }
  0x9b   : > { %v1106_v36 = vld [vmem:[%s6007_s30 + $0xbc] sm:$0x3] }
  0x9c   : > { %v1201_v52 = vsel %vm6214_vm6, %v4570_v50, %v1200_v40  ;;  %v1221_v40 = vrot.slane %v6268_v30, 6  ;;  %v6670_v30 = vld [vmem:[%s6007_s30 + $0x64] sm:$0xf] }
  0x9d   : > { %5324 = vmatmul.mubr.msk.bf16.vlgmr.msra.gmra.mrb[0].mxu1 %vm585_vm4, %v4580_v33  ;;  %v4921_v33 = vld [vmem:[%s6007_s30 + $0x38] sm:$0x1]  ;;  %v4587_v44 = vcombine.low %v1201_v52, %v1204_v18  ;;  %v1230_v52 = vrot.slane %v1228_v13, 4  ;;  %v1231_v18 = vrot.slane %v1100_v7, 6 }
  0x9e   : > { %5356 = vmatpush3.bf16.msra.mxu1 %v1712_v23  ;;  %5327 = vmatprep.mubr.msk.bf16.mxu1 %vm585_vm4, %v4581_v16  ;;  %v5881_v16 = vld [vmem:[%s6007_s30 + $0xcc] sm:$0xff]   ;;  %v1197_v23 = vsel %vm6214_vm6, %v1195_v2, %v1196_v5  ;;  %v3339_v32 = vrot.slane %v4921_v33, 5  ;;  %v6661_v5 = vld [vmem:[%s6007_s30 + $0x58] sm:$0xf]  ;;  %v1223_v48 = vrot.slane %v1221_v40, 4 }
  0x9f   : > { %5822 = vmatprep.subr.msk.bf16.mxu1 %vm634_vm0, %v5904_v42  ;;  %v4586_v38 = vcombine.low %v1194_v35, %v1197_v23  ;;  %v1209_v42 = vrot.slane %v1207_v24, 4  ;;  %v1098_v2 = vld [vmem:[%s6007_s30 + $0x8c] sm:$0x3]  ;;  %v4928_v23 = vld [vmem:[%s6007_s30 + $0x54] sm:$0xe]  ;;  %v3357_v24 = vrot.slane %v6661_v5, 5  ;;  %v1232_v41 = vsel %vm6214_vm6, %v1230_v52, %v1231_v18 }
  0xa0   : > { %5476 = vmatmul.mubr.msk.bf16.gmra.mrb[16].mxu0 %vm585_vm4, %v5877_v28  ;;  %v3338_v28 = vrot.slane %v3336_v9, 4  ;;  %v1224_v35 = vrot.slane %v1098_v2, 6  ;;  %v4934_v2 = vld [vmem:[%s6007_s30 + $0x6c] sm:$0xe] }
  0xa1   : > { %5479 = vmatprep.mubr.msk.bf16.mxu0 %vm585_vm4, %v5878_v43  ;;  %v1094_v43 = vld [vmem:[%s6007_s30 + $0x74] sm:$0x3]  ;;  %v3359_v51 = vrot.slane %v3357_v24, 4 }
  0xa2   : > { %v1210_v62 = vrot.slane %v1094_v43, 6  ;;  %v3340_v61 = vsel %vm6009_vm3, %v3338_v28, %v3339_v32  ;;  %v4930_v32 = vld [vmem:[%s6007_s30 + $0x5c] sm:$0x1] }
  0xa4   : > { %v1211_v57 = vsel %vm6214_vm6, %v1209_v42, %v1210_v62  ;;  %v1225_v62 = vsel %vm6214_vm6, %v1223_v48, %v1224_v35 }
  0xa5   : > { %5328 = vmatmul.mubr.msk.bf16.gmra.mrb[4].mxu1 %vm585_vm4, %v4582_v60  ;;  %v4924_v60 = vld [vmem:[%s6007_s30 + $0x44] sm:$0x1]  ;;  %v4588_v15 = vcombine.low %v1208_v56, %v1211_v57  ;;  %v1104_v56 = vld [vmem:[%s6007_s30 + $0xb0] sm:$0x3]  ;;  %v6713_v57 = vld [vmem:[%s6007_s30 + $0x7c] sm:$0xf] }
  0xa6   : > { %5331 = vmatprep.mubr.msk.bf16.mxu1 %vm585_vm4, %v4583_v21  ;;  %v3337_v21 = vsel %vm6009_vm3, %v4967_v25, %v3336_v9  ;;  %v3346_v55 = vrot.slane %v4924_v60, 5  ;;  %v1099_v9 = vld [vmem:[%s6007_s30 + $0x90] sm:$0xc]  ;;  %v3360_v60 = vrot.slane %v4930_v32, 5  ;;  %v1249_v32 = vrot.slane %v6344_v1, 6 }
  0xa7   : > { %v4984_v17 = vcombine.low %v3337_v21, %v3340_v61  ;;  %v4574_v43 = vrot.slane %v1099_v9, 10  ;;  %v1102_v21 = vld [vmem:[%s6007_s30 + $0xa4] sm:$0x3]  ;;  %v3367_v61 = vrot.slane %v4933_v37, 5  ;;  %v6743_v37 = vld [vmem:[%s6007_s30 + $0x88] sm:$0xf] }
  0xa8   : > { %5480 = vmatmul.mubr.msk.bf16.gmra.mrb[20].mxu0 %vm585_vm4, %v5879_v47  ;;  %v1217_v47 = vrot.slane %v1096_v54, 6  ;;  %v3347_v33 = vsel %vm6009_vm3, %v3345_v4, %v3346_v55  ;;  %v1242_v4 = vrot.slane %v6329_v39, 6 }
  0xa9   : > { %5483 = vmatprep.mubr.msk.bf16.mxu0 %vm585_vm4, %v5880_v53  ;;  %v4927_v53 = vld [vmem:[%s6007_s30 + $0x50] sm:$0x1]  ;;  %v4985_v10 = vcombine.low %v3344_v0, %v3347_v33  ;;  %v3378_v0 = vrot.slane %v6713_v57, 5 }
  0xaa   : > { %v3353_v22 = vrot.slane %v4927_v53, 5  ;;  %v1218_v50 = vsel %vm6214_vm6, %v1216_v46, %v1217_v47  ;;  %v6699_v46 = vld [vmem:[%s6007_s30 + $0x70] sm:$0xf]  ;;  %v4015_v47 = vsel %vm634_vm0, %v6503_v12, 0  ;;  %v1229_v53 = vsel %vm6214_vm6, %v4574_v43, %v1228_v13 }
  0xab   : > { %v3361_v12 = vsel %vm6009_vm3, %v3359_v51, %v3360_v60  ;;  %v3371_v39 = vrot.slane %v6699_v46, 5  ;;  %v1244_v9 = vrot.slane %v1242_v4, 4  ;;  %v1245_v13 = vrot.slane %v1104_v56, 6 }
  0xac   : > { %v3380_v52 = vrot.slane %v3378_v0, 4  ;;  %v1251_v51 = vrot.slane %v1249_v32, 4  ;;  %v1252_v60 = vrot.slane %v1106_v36, 6 }
  0xad   : > { %5332 = vmatmul.mubr.msk.bf16.gmra.mrb[8].mxu1 %vm585_vm4, %v4584_v14  ;;  %v3352_v14 = vrot.slane %v3350_v19, 4  ;;  %v3373_v48 = vrot.slane %v3371_v39, 4 }
  0xae   : > { %5335 = vmatprep.mubr.msk.bf16.mxu1 %vm585_vm4, %v4585_v8  ;;  %v1215_v8 = vsel %vm6214_vm6, %v4572_v45, %v1214_v31  ;;  %v3364_v31 = vrot.slane %v6670_v30, 5  ;;  %v1235_v45 = vrot.slane %v6304_v11, 6  ;;  %v1103_v11 = vld [vmem:[%s6007_s30 + $0xa8] sm:$0xc] }
  0xaf   : > { %v4589_v25 = vcombine.low %v1215_v8, %v1218_v50  ;;  %v3354_v28 = vsel %vm6009_vm3, %v3352_v14, %v3353_v22  ;;  %v4936_v8 = vld [vmem:[%s6007_s30 + $0x74] sm:$0x1]  ;;  %v4576_v50 = vrot.slane %v1103_v11, 10  ;;  %v1253_v11 = vsel %vm6214_vm6, %v1251_v51, %v1252_v60  ;;  %v4954_v51 = vld [vmem:[%s6007_s30 + $0xbc] sm:$0x1] }
  0xb0   : > { %5484 = vmatmul.mubr.msk.bf16.gmra.mrb[24].mxu0 %vm585_vm4, %v5881_v16  ;;  %v4573_v16 = vrot.slane %v1097_v59, 10  ;;  %v1238_v59 = vrot.slane %v1102_v21, 6  ;;  %v1237_v22 = vrot.slane %v1235_v45, 4  ;;  %v3374_v35 = vrot.slane %v4936_v8, 5  ;;  %v5884_v8 = vld [vmem:[%s6007_s30 + $0x18] sm:$0xff]  }
  0xb1   : > { %5487 = vmatprep.mubr.msk.bf16.mxu0 %vm585_vm4, %v5882_v20  ;;  %v3351_v20 = vsel %vm6009_vm3, %v4969_v58, %v3350_v19  ;;  %v3366_v19 = vrot.slane %v3364_v31, 4  ;;  %v1243_v43 = vsel %vm6214_vm6, %v4576_v50, %v1242_v4  ;;  %v3385_v21 = vrot.slane %v6743_v37, 5 }
  0xb2   : > { %v1222_v54 = vsel %vm6214_vm6, %v4573_v16, %v1221_v40  ;;  %v4986_v42 = vcombine.low %v3351_v20, %v3354_v28  ;;  %v4591_v40 = vcombine.low %v1229_v53, %v1232_v41  ;;  %v4939_v16 = vld [vmem:[%s6007_s30 + $0x80] sm:$0x1]  ;;  %v4972_v20 = vrot.slane %v4934_v2, 9  ;;  %v1105_v28 = vld [vmem:[%s6007_s30 + $0xb4] sm:$0xc] }
  0xb3   : > { %v4590_v55 = vcombine.low %v1222_v54, %v1225_v62  ;;  %v3368_v14 = vsel %vm6009_vm3, %v3366_v19, %v3367_v61  ;;  %v3381_v18 = vrot.slane %v4939_v16, 5  ;;  %v4942_v61 = vld [vmem:[%s6007_s30 + $0x8c] sm:$0x1]  ;;  %v4945_v53 = vld [vmem:[%s6007_s30 + $0x98] sm:$0x1]  ;;  %v3387_v56 = vrot.slane %v3385_v21, 4 }
  0xb4   : > { %v3372_v54 = vsel %vm6009_vm3, %v4972_v20, %v3371_v39  ;;  %v3395_v39 = vrot.slane %v4945_v53, 5  ;;  %v4949_v16 = vld [vmem:[%s6007_s30 + $0xa8] sm:$0xe] }
  0xb5   : > { %5336 = vmatmul.mubr.msk.bf16.gmra.mrb[12].mxu1 %vm585_vm4, %v4586_v38  ;;  %v4970_v38 = vrot.slane %v4928_v23, 9  ;;  %v3382_v19 = vsel %vm6009_vm3, %v3380_v52, %v3381_v18  ;;  %v5885_v52 = vld [vmem:[%s6007_s30 + $0x24] sm:$0xff]  }
  0xb6   : > { %5339 = vmatprep.mubr.msk.bf16.mxu1 %vm585_vm4, %v4587_v44  ;;  %v1101_v44 = vld [vmem:[%s6007_s30 + $0x9c] sm:$0xc] }
  0xb7   : > { %v4575_v58 = vrot.slane %v1101_v44, 10  ;;  %v4940_v44 = vld [vmem:[%s6007_s30 + $0x84] sm:$0xe] }
  0xb8   : > { %5488 = vmatmul.mubr.msk.bf16.gmra.mrb[28].mxu0 %vm585_vm4, %v5883_v49  ;;  %v3358_v49 = vsel %vm6009_vm3, %v4970_v38, %v3357_v24  ;;  %v1239_v24 = vsel %vm6214_vm6, %v1237_v22, %v1238_v59  ;;  %v3375_v38 = vsel %vm6009_vm3, %v3373_v48, %v3374_v35 }
  0xb9   : > { %5493 = vmatprep.mubr.msk.bf16.mxu0 %vm585_vm4, %v4984_v17  ;;  %v3365_v17 = vsel %vm6009_vm3, %v4971_v27, %v3364_v31  ;;  %v4987_v33 = vcombine.low %v3358_v49, %v3361_v12  ;;  %v1236_v7 = vsel %vm6214_vm6, %v4575_v58, %v1235_v45  ;;  %v1246_v31 = vsel %vm6214_vm6, %v1244_v9, %v1245_v13 }
  0xba   : > { %v4988_v23 = vcombine.low %v3365_v17, %v3368_v14  ;;  %v4592_v1 = vcombine.low %v1236_v7, %v1239_v24  ;;  %v4593_v62 = vcombine.low %v1243_v43, %v1246_v31  ;;  %v4989_v41 = vcombine.low %v3372_v54, %v3375_v38  ;;  %v6774_v17 = vld [vmem:[%s6007_s30 + $0xac] sm:$0xf]  ;;  %v4951_v7 = vld [vmem:[%s6007_s30 + $0xb0] sm:$0x1]  ;;  %v6796_v43 = vld [vmem:[%s6007_s30 + $0xb8] sm:$0xf] }
  0xbb   : > { %v3388_v12 = vrot.slane %v4942_v61, 5  ;;  %v6799_v31 = vld [vmem:[%s6007_s30 + $0xc4] sm:$0xf]  ;;  %v3413_v54 = vrot.slane %v6796_v43, 5 }
  0xbc   : > { %v3420_v60 = vrot.slane %v6799_v31, 5 }
  0xbd   : > { %5340 = vmatmul.mubr.msk.bf16.gmra.mrb[16].mxu1 %vm585_vm4, %v4588_v15  ;;  %v4937_v15 = vld [vmem:[%s6007_s30 + $0x78] sm:$0xe]  ;;  %v3389_v2 = vsel %vm6009_vm3, %v3387_v56, %v3388_v12  ;;  %v5888_v12 = vld [vmem:[%s6007_s30 + $0x48] sm:$0xff]  }
  0xbe   : > { %5343 = vmatprep.mubr.msk.bf16.mxu1 %vm585_vm4, %v4589_v25  ;;  %v4973_v25 = vrot.slane %v4937_v15, 9  ;;  %v4946_v15 = vld [vmem:[%s6007_s30 + $0x9c] sm:$0xe] }
  0xbf   : > { %v4976_v35 = vrot.slane %v4946_v15, 9 }
  0xc0   : > { %5494 = vmatmul.mubr.msk.bf16.vlgmr.msra.gmra.mrb[0].mxu0 %vm585_vm4, %v4985_v10  ;;  %v6746_v10 = vld [vmem:[%s6007_s30 + $0x94] sm:$0xf]  ;;  %v3379_v27 = vsel %vm6009_vm3, %v4973_v25, %v3378_v0  ;;  %v4948_v0 = vld [vmem:[%s6007_s30 + $0xa4] sm:$0x1]  ;;  %v4977_v25 = vrot.slane %v4949_v16, 9 }
  0xc1   : > { %5526 = vmatpush3.bf16.msra.mxu0 %v4015_v47  ;;  %5497 = vmatprep.mubr.msk.bf16.mxu0 %vm585_vm4, %v4986_v42  ;;  %v4577_v42 = vrot.slane %v1105_v28, 10  ;;  %v3392_v45 = vrot.slane %v6746_v10, 5  ;;  %v4943_v47 = vld [vmem:[%s6007_s30 + $0x90] sm:$0xe]  ;;  %v4990_v49 = vcombine.low %v3379_v27, %v3382_v19  ;;  %v3402_v24 = vrot.slane %v4948_v0, 5 }
  0xc2   : > { %v4975_v58 = vrot.slane %v4943_v47, 9  ;;  %v3416_v47 = vrot.slane %v4954_v51, 5 }
  0xc3   : > { %v1250_v4 = vsel %vm6214_vm6, %v4577_v42, %v1249_v32  ;;  %v3394_v59 = vrot.slane %v3392_v45, 4  ;;  %v3409_v32 = vrot.slane %v4951_v7, 5 }
  0xc4   : > { %v4594_v14 = vcombine.low %v1250_v4, %v1253_v11  ;;  %v3393_v9 = vsel %vm6009_vm3, %v4975_v58, %v3392_v45  ;;  %v3415_v45 = vrot.slane %v3413_v54, 4 }
  0xc5   : > { %5344 = vmatmul.mubr.msk.bf16.gmra.mrb[20].mxu1 %vm585_vm4, %v4590_v55  ;;  %v4974_v55 = vrot.slane %v4940_v44, 9  ;;  %v3396_v13 = vsel %vm6009_vm3, %v3394_v59, %v3395_v39  ;;  %v4955_v44 = vld [vmem:[%s6007_s30 + $0xc0] sm:$0xe] }
  0xc6   : > { %5347 = vmatprep.mubr.msk.bf16.mxu1 %vm585_vm4, %v4591_v40  ;;  %v6771_v40 = vld [vmem:[%s6007_s30 + $0xa0] sm:$0xf]  ;;  %v4992_v48 = vcombine.low %v3393_v9, %v3396_v13  ;;  %v4979_v53 = vrot.slane %v4955_v44, 9  ;;  %v3417_v56 = vsel %vm6009_vm3, %v3415_v45, %v3416_v47  ;;  %v5892_v47 = vld [vmem:[%s6007_s30 + $0x78] sm:$0xff]  }
  0xc7   : > { %v3386_v22 = vsel %vm6009_vm3, %v4974_v55, %v3385_v21  ;;  %v3399_v50 = vrot.slane %v6771_v40, 5  ;;  %v4957_v21 = vld [vmem:[%s6007_s30 + $0xc8] sm:$0x1]  ;;  %v6823_v55 = vld [vmem:[%s6007_s30 + $0xd0] sm:$0xf] }
  0xc8   : > { %5498 = vmatmul.mubr.msk.bf16.gmra.mrb[4].mxu0 %vm585_vm4, %v4987_v33  ;;  %v3406_v33 = vrot.slane %v6774_v17, 5  ;;  %v4991_v20 = vcombine.low %v3386_v22, %v3389_v2  ;;  %v3423_v4 = vrot.slane %v4957_v21, 5  ;;  %v3427_v58 = vrot.slane %v6823_v55, 5  ;;  %v4960_v22 = vld [vmem:[%s6007_s30 + $0xd4] sm:$0x1] }
  0xc9   : > { %5501 = vmatprep.mubr.msk.bf16.mxu0 %vm585_vm4, %v4988_v23  ;;  %v3401_v23 = vrot.slane %v3399_v50, 4  ;;  %v3400_v18 = vsel %vm6009_vm3, %v4976_v35, %v3399_v50  ;;  %v3421_v59 = vsel %vm6009_vm3, %v4979_v53, %v3420_v60  ;;  %v4963_v50 = vld [vmem:[%s6007_s30 + $0xe0] sm:$0x1]  ;;  %v5889_v35 = vld [vmem:[%s6007_s30 + $0x54] sm:$0xff]   ;;  %v3813_v53 = vrot.slane %v6624_v29, 6 }
  0xca   : > { %v3408_v28 = vrot.slane %v3406_v33, 4  ;;  %v3407_v38 = vsel %vm6009_vm3, %v4977_v25, %v3406_v33  ;;  %v3429_v0 = vrot.slane %v3427_v58, 4  ;;  %v3430_v33 = vrot.slane %v4960_v22, 5  ;;  %v5890_v25 = vld [vmem:[%s6007_s30 + $0x60] sm:$0xff]  }
  0xcb   : > { %v3403_v36 = vsel %vm6009_vm3, %v3401_v23, %v3402_v24 }
  0xcc   : > { %v3410_v42 = vsel %vm6009_vm3, %v3408_v28, %v3409_v32  ;;  %v4993_v27 = vcombine.low %v3400_v18, %v3403_v36  ;;  %v3431_v24 = vsel %vm6009_vm3, %v3429_v0, %v3430_v33  ;;  %v4964_v18 = vld [vmem:[%s6007_s30 + $0xe4] sm:$0xe]  ;;  %v4966_v36 = vld [vmem:[%s6007_s30 + $0xec] sm:$0x1]  ;;  %v3827_v0 = vrot.slane %v6661_v5, 6 }
  0xcd   : > { %5348 = vmatmul.mubr.msk.bf16.gmra.mrb[24].mxu1 %vm585_vm4, %v4592_v1  ;;  %v5886_v1 = vld [vmem:[%s6007_s30 + $0x30] sm:$0xff]   ;;  %v4994_v19 = vcombine.low %v3407_v38, %v3410_v42  ;;  %v5017_v38 = vld [vmem:[%s6007_s30 + $0x38] sm:$0x3]  ;;  %v4982_v51 = vrot.slane %v4964_v18, 9  ;;  %v3444_v44 = vrot.slane %v4966_v36, 5 }
  0xce   : > { %5351 = vmatprep.mubr.msk.bf16.mxu1 %vm585_vm4, %v4593_v62  ;;  %v4952_v62 = vld [vmem:[%s6007_s30 + $0xb4] sm:$0xe] }
  0xcf   : > { %v4978_v61 = vrot.slane %v4952_v62, 9 }
  0xd0   : > { %5502 = vmatmul.mubr.msk.bf16.gmra.mrb[8].mxu0 %vm585_vm4, %v4989_v41  ;;  %v3422_v41 = vrot.slane %v3420_v60, 4 }
  0xd1   : > { %5505 = vmatprep.mubr.msk.bf16.mxu0 %vm585_vm4, %v4990_v49  ;;  %v6826_v49 = vld [vmem:[%s6007_s30 + $0xdc] sm:$0xf]  ;;  %v3414_v11 = vsel %vm6009_vm3, %v4978_v61, %v3413_v54  ;;  %v5016_v54 = vld [vmem:[%s6007_s30 + $0x30] sm:$0xc] }
  0xd2   : > { %v3424_v39 = vsel %vm6009_vm3, %v3422_v41, %v3423_v4  ;;  %v3434_v2 = vrot.slane %v6826_v49, 5  ;;  %v4995_v9 = vcombine.low %v3414_v11, %v3417_v56  ;;  %v5048_v21 = vrot.slane %v5016_v54, 10  ;;  %v5019_v11 = vld [vmem:[%s6007_s30 + $0x44] sm:$0x3] }
  0xd3   : > { %v4996_v13 = vcombine.low %v3421_v59, %v3424_v39  ;;  %v3820_v56 = vrot.slane %v6634_v34, 6  ;;  %v3816_v22 = vrot.slane %v5019_v11, 6  ;;  %v5893_v34 = vld [vmem:[%s6007_s30 + $0x84] sm:$0xff]   ;;  %v5905_v11 = vld [vmem:[%s6007_s30 + $0x7c] sm:$0xf] }
  0xd4   : > { %v3436_v7 = vrot.slane %v3434_v2, 4 }
  0xd5   : > { %5352 = vmatmul.mubr.msk.bf16.gmra.mrb[28].mxu1 %vm585_vm4, %v4594_v14  ;;  %v4958_v14 = vld [vmem:[%s6007_s30 + $0xcc] sm:$0xe] }
  0xd6   : > { %5357 = vmatprep.mubr.msk.bf16.mxu1 %vm585_vm4, %v5884_v8  ;;  %v4961_v8 = vld [vmem:[%s6007_s30 + $0xd8] sm:$0xe]  ;;  %v4980_v15 = vrot.slane %v4958_v14, 9  ;;  %v3815_v14 = vrot.slane %v3813_v53, 4 }
  0xd7   : > { %v4981_v16 = vrot.slane %v4961_v8, 9  ;;  %v3822_v8 = vrot.slane %v3820_v56, 4 }
  0xd8   : > { %5506 = vmatmul.mubr.msk.bf16.gmra.mrb[12].mxu0 %vm585_vm4, %v4991_v20  ;;  %v3437_v20 = vrot.slane %v4963_v50, 5  ;;  %v3428_v23 = vsel %vm6009_vm3, %v4980_v15, %v3427_v58  ;;  %v5021_v58 = vld [vmem:[%s6007_s30 + $0x50] sm:$0x3] }
  0xd9   : > { %5509 = vmatprep.mubr.msk.bf16.mxu0 %vm585_vm4, %v4992_v48  ;;  %v6849_v48 = vld [vmem:[%s6007_s30 + $0xe8] sm:$0xf]  ;;  %v3435_v32 = vsel %vm6009_vm3, %v4981_v16, %v3434_v2  ;;  %v4997_v42 = vcombine.low %v3428_v23, %v3431_v24  ;;  %v3823_v50 = vrot.slane %v5021_v58, 6  ;;  %v5894_v15 = vld [vmem:[%s6007_s30 + $0x90] sm:$0xff]   ;;  %v5024_v23 = vld [vmem:[%s6007_s30 + $0x60] sm:$0xc] }
  0xda   : > { %v3441_v28 = vrot.slane %v6849_v48, 5  ;;  %v5025_v24 = vld [vmem:[%s6007_s30 + $0x68] sm:$0x3]  ;;  %v5052_v18 = vrot.slane %v5024_v23, 10 }
  0xdb   : > { %v3824_v16 = vsel %vm6214_vm6, %v3822_v8, %v3823_v50  ;;  %v6935_v58 = vld [vmem:[%s6007_s30 + $0x88] sm:$0xf]  ;;  %v5898_v8 = vld [vmem:[%s6007_s30 + $0xc0] sm:$0xff]  }
  0xdc   : > { %v3443_v60 = vrot.slane %v3441_v28, 4  ;;  %v3442_v61 = vsel %vm6009_vm3, %v4982_v51, %v3441_v28  ;;  %v3841_v51 = vrot.slane %v6699_v46, 6 }
  0xdd   : > { %5358 = vmatmul.mubr.msk.bf16.vlgmr.msra.gmra.mrb[0].mxu1 %vm585_vm4, %v5885_v52  ;;  %v3438_v52 = vsel %vm6009_vm3, %v3436_v7, %v3437_v20  ;;  %v5022_v7 = vld [vmem:[%s6007_s30 + $0x54] sm:$0xc]  ;;  %v5023_v20 = vld [vmem:[%s6007_s30 + $0x5c] sm:$0x3] }
  0xde   : > { %5560 = vmatpush3.bf16.msra.mxu1 %v5990_v3  ;;  %5361 = vmatprep.mubr.msk.bf16.mxu1 %vm585_vm4, %v5886_v1  ;;  %v5887_v3 = vld [vmem:[%s6007_s30 + $0x3c] sm:$0xff]   ;;  %v3806_v1 = vrot.slane %v6606_v63, 6  ;;  %v4998_v62 = vcombine.low %v3435_v32, %v3438_v52  ;;  %v5891_v63 = vld [vmem:[%s6007_s30 + $0x6c] sm:$0xff]   ;;  %v3445_v45 = vsel %vm6009_vm3, %v3443_v60, %v3444_v44  ;;  %v5051_v28 = vrot.slane %v5022_v7, 10 }
  0xdf   : > { %v4999_v59 = vcombine.low %v3442_v61, %v3445_v45  ;;  %v3829_v32 = vrot.slane %v3827_v0, 4  ;;  %v3830_v52 = vrot.slane %v5023_v20, 6 }
  0xe0   : > { %5510 = vmatmul.mubr.msk.bf16.gmra.mrb[16].mxu0 %vm585_vm4, %v4993_v27  ;;  %v3808_v27 = vrot.slane %v3806_v1, 4  ;;  %v3807_v41 = vsel %vm6214_vm6, %v5048_v21, %v3806_v1  ;;  %v3837_v1 = vrot.slane %v5025_v24, 6  ;;  %v3828_v54 = vsel %vm6214_vm6, %v5051_v28, %v3827_v0  ;;  %v5027_v21 = vld [vmem:[%s6007_s30 + $0x74] sm:$0x3]  ;;  %v4703_v28 = vld [vmem:[%s6007_s30 + $0x84] sm:$0xe] }
  0xe1   : > { %5513 = vmatprep.mubr.msk.bf16.mxu0 %vm585_vm4, %v4994_v19  ;;  %v3809_v19 = vrot.slane %v5017_v38, 6  ;;  %v3831_v38 = vsel %vm6214_vm6, %v3829_v32, %v3830_v52  ;;  %v4705_v32 = vld [vmem:[%s6007_s30 + $0x8c] sm:$0x1] }
  0xe2   : > { %v5068_v61 = vcombine.low %v3828_v54, %v3831_v38  ;;  %v5034_v38 = vld [vmem:[%s6007_s30 + $0x9c] sm:$0xc] }
  0xe3   : > { %v3810_v4 = vsel %vm6214_vm6, %v3808_v27, %v3809_v19  ;;  %v5028_v27 = vld [vmem:[%s6007_s30 + $0x78] sm:$0xc]  ;;  %v3848_v19 = vrot.slane %v6713_v57, 6  ;;  %v2061_v57 = vrot.slane %v5905_v11, 5  ;;  %v5057_v11 = vrot.slane %v5034_v38, 10 }
  0xe4   : > { %v5065_v29 = vcombine.low %v3807_v41, %v3810_v4  ;;  %v5054_v41 = vrot.slane %v5028_v27, 10  ;;  %v5035_v27 = vld [vmem:[%s6007_s30 + $0xa4] sm:$0x3] }
  0xe5   : > { %5362 = vmatmul.mubr.msk.bf16.gmra.mrb[4].mxu1 %vm585_vm4, %v5887_v3  ;;  %v5018_v3 = vld [vmem:[%s6007_s30 + $0x3c] sm:$0xc]  ;;  %v3850_v4 = vrot.slane %v3848_v19, 4  ;;  %v2063_v0 = vrot.slane %v2061_v57, 4 }
  0xe6   : > { %5365 = vmatprep.mubr.msk.bf16.mxu1 %vm585_vm4, %v5888_v12  ;;  %v5020_v12 = vld [vmem:[%s6007_s30 + $0x48] sm:$0xc]  ;;  %v5049_v39 = vrot.slane %v5018_v3, 10  ;;  %v3849_v50 = vsel %vm6214_vm6, %v5054_v41, %v3848_v19  ;;  %v3869_v19 = vrot.slane %v6771_v40, 6 }
  0xe7   : > { %v5050_v2 = vrot.slane %v5020_v12, 10  ;;  %v4702_v12 = vld [vmem:[%s6007_s30 + $0x80] sm:$0x1] }
  0xe8   : > { %5514 = vmatmul.mubr.msk.bf16.gmra.mrb[20].mxu0 %vm585_vm4, %v4995_v9  ;;  %v3814_v9 = vsel %vm6214_vm6, %v5049_v39, %v3813_v53  ;;  %v3844_v53 = vrot.slane %v5027_v21, 6  ;;  %v5030_v39 = vld [vmem:[%s6007_s30 + $0x84] sm:$0xc]  ;;  %v2071_v21 = vrot.slane %v4705_v32, 5  ;;  %v3890_v32 = vrot.slane %v6799_v31, 6 }
  0xe9   : > { %5517 = vmatprep.mubr.msk.bf16.mxu0 %vm585_vm4, %v4996_v13  ;;  %v3817_v13 = vsel %vm6214_vm6, %v3815_v14, %v3816_v22  ;;  %v3821_v33 = vsel %vm6214_vm6, %v5050_v2, %v3820_v56  ;;  %v4700_v56 = vld [vmem:[%s6007_s30 + $0x78] sm:$0xe]  ;;  %v3855_v14 = vrot.slane %v6743_v37, 6  ;;  %v5055_v7 = vrot.slane %v5030_v39, 10  ;;  %v5908_v39 = vld [vmem:[%s6007_s30 + $0xa0] sm:$0xf] }
  0xea   : > { %v5067_v5 = vcombine.low %v3821_v33, %v3824_v16  ;;  %v2064_v33 = vrot.slane %v4702_v12, 5  ;;  %v5033_v16 = vld [vmem:[%s6007_s30 + $0x98] sm:$0x3] }
  0xeb   : > { %v3856_v54 = vsel %vm6214_vm6, %v5055_v7, %v3855_v14 }
  0xed   : > { %5366 = vmatmul.mubr.msk.bf16.gmra.mrb[8].mxu1 %vm585_vm4, %v5889_v35  ;;  %v3834_v35 = vrot.slane %v6670_v30, 6  ;;  %v5895_v30 = vld [vmem:[%s6007_s30 + $0x9c] sm:$0xff]  }
  0xee   : > { %5369 = vmatprep.mubr.msk.bf16.mxu1 %vm585_vm4, %v5890_v25  ;;  %v5066_v25 = vcombine.low %v3814_v9, %v3817_v13  ;;  %v5032_v9 = vld [vmem:[%s6007_s30 + $0x90] sm:$0xc]  ;;  %v3862_v13 = vrot.slane %v6746_v10, 6 }
  0xef   : > { %v3836_v36 = vrot.slane %v3834_v35, 4  ;;  %v3835_v60 = vsel %vm6214_vm6, %v5052_v18, %v3834_v35  ;;  %v3857_v35 = vrot.slane %v3855_v14, 4  ;;  %v5056_v10 = vrot.slane %v5032_v9, 10  ;;  %v5909_v9 = vld [vmem:[%s6007_s30 + $0xac] sm:$0xf] }
  0xf0   : > { %5518 = vmatmul.mubr.msk.bf16.gmra.mrb[24].mxu0 %vm585_vm4, %v4997_v42  ;;  %v5896_v42 = vld [vmem:[%s6007_s30 + $0xa8] sm:$0xff]   ;;  %v2082_v14 = vrot.slane %v5908_v39, 5 }
  0xf1   : > { %5521 = vmatprep.mubr.msk.bf16.mxu0 %vm585_vm4, %v4998_v62  ;;  %v5026_v62 = vld [vmem:[%s6007_s30 + $0x6c] sm:$0xc]  ;;  %v3838_v44 = vsel %vm6214_vm6, %v3836_v36, %v3837_v1  ;;  %v2065_v36 = vsel %vm6009_vm3, %v2063_v0, %v2064_v33  ;;  %v5907_v1 = vld [vmem:[%s6007_s30 + $0x94] sm:$0xf]  ;;  %v4712_v33 = vld [vmem:[%s6007_s30 + $0xa8] sm:$0xe] }
  0xf2   : > { %v5053_v46 = vrot.slane %v5026_v62, 10  ;;  %v5069_v45 = vcombine.low %v3835_v60, %v3838_v44  ;;  %v4708_v62 = vld [vmem:[%s6007_s30 + $0x98] sm:$0x1]  ;;  %v4733_v44 = vrot.slane %v4703_v28, 9  ;;  %v5040_v28 = vld [vmem:[%s6007_s30 + $0xc0] sm:$0xc] }
  0xf3   : > { %v2078_v41 = vrot.slane %v4708_v62, 5 }
  0xf4   : > { %v3842_v22 = vsel %vm6214_vm6, %v5053_v46, %v3841_v51 }
  0xf5   : > { %5370 = vmatmul.mubr.msk.bf16.gmra.mrb[12].mxu1 %vm585_vm4, %v5891_v63  ;;  %v5029_v63 = vld [vmem:[%s6007_s30 + $0x80] sm:$0x3] }
  0xf6   : > { %5373 = vmatprep.mubr.msk.bf16.mxu1 %vm585_vm4, %v5892_v47  ;;  %v3843_v47 = vrot.slane %v3841_v51, 4  ;;  %v3851_v3 = vrot.slane %v5029_v63, 6  ;;  %v5899_v51 = vld [vmem:[%s6007_s30 + $0xcc] sm:$0xff]  }
  0xf8   : > { %5522 = vmatmul.mubr.msk.bf16.gmra.mrb[28].mxu0 %vm585_vm4, %v4999_v59  ;;  %v2068_v59 = vrot.slane %v6935_v58, 5  ;;  %v3845_v2 = vsel %vm6214_vm6, %v3843_v47, %v3844_v53  ;;  %v3852_v37 = vsel %vm6214_vm6, %v3850_v4, %v3851_v3  ;;  %v5037_v4 = vld [vmem:[%s6007_s30 + $0xb0] sm:$0x3]  ;;  %v3876_v3 = vrot.slane %v6774_v17, 6 }
  0xf9   : > { %5527 = vmatprep.mubr.msk.bf16.mxu0 %vm585_vm4, %v5065_v29  ;;  %v5897_v29 = vld [vmem:[%s6007_s30 + $0xb4] sm:$0xff]   ;;  %v5070_v20 = vcombine.low %v3842_v22, %v3845_v2  ;;  %v5071_v24 = vcombine.low %v3849_v50, %v3852_v37  ;;  %v3871_v58 = vrot.slane %v3869_v19, 4  ;;  %v3879_v2 = vrot.slane %v5037_v4, 6 }
  0xfa   : > { %v2070_v52 = vrot.slane %v2068_v59, 4 }
  0xfc   : > { %v2072_v12 = vsel %vm6009_vm3, %v2070_v52, %v2071_v21 }
  0xfd   : > { %5374 = vmatmul.mubr.msk.bf16.gmra.mrb[16].mxu1 %vm585_vm4, %v5893_v34  ;;  %v5031_v34 = vld [vmem:[%s6007_s30 + $0x8c] sm:$0x3] }
  0xfe   : > { %5377 = vmatprep.mubr.msk.bf16.mxu1 %vm585_vm4, %v5894_v15  ;;  %v4732_v15 = vrot.slane %v4700_v56, 9  ;;  %v3858_v23 = vrot.slane %v5031_v34, 6  ;;  %v2069_v56 = vsel %vm6009_vm3, %v4733_v44, %v2068_v59  ;;  %v3878_v34 = vrot.slane %v3876_v3, 4 }
  0xff   : > { %v4750_v37 = vcombine.low %v2069_v56, %v2072_v12  ;;  %v3892_v44 = vrot.slane %v3890_v32, 4  ;;  %v3897_v12 = vrot.slane %v6823_v55, 6  ;;  %v5045_v55 = vld [vmem:[%s6007_s30 + $0xe0] sm:$0x3] }
 0x100   : > { %5528 = vmatmul.mubr.msk.bf16.vlgmr.msra.gmra.mrb[0].mxu0 %vm585_vm4, %v5066_v25  ;;  %v3864_v25 = vrot.slane %v3862_v13, 4  ;;  %v2062_v18 = vsel %vm6009_vm3, %v4732_v15, %v2061_v57  ;;  %v3859_v60 = vsel %vm6214_vm6, %v3857_v35, %v3858_v23  ;;  %v3872_v57 = vrot.slane %v5035_v27, 6  ;;  %v5038_v23 = vld [vmem:[%s6007_s30 + $0xb4] sm:$0xc] }
 0x101   : > { %5531 = vmatprep.mubr.msk.bf16.mxu0 %vm585_vm4, %v5067_v5  ;;  %v3865_v5 = vrot.slane %v5033_v16, 6  ;;  %v4749_v63 = vcombine.low %v2062_v18, %v2065_v36  ;;  %v5072_v40 = vcombine.low %v3856_v54, %v3859_v60  ;;  %v3870_v15 = vsel %vm6214_vm6, %v5057_v11, %v3869_v19  ;;  %v4714_v16 = vld [vmem:[%s6007_s30 + $0xb0] sm:$0x1]  ;;  %v4715_v27 = vld [vmem:[%s6007_s30 + $0xb4] sm:$0xe] }
 0x102   : > { %v3873_v7 = vsel %vm6214_vm6, %v3871_v58, %v3872_v57  ;;  %v3880_v52 = vsel %vm6214_vm6, %v3878_v34, %v3879_v2  ;;  %v4736_v18 = vrot.slane %v4712_v33, 9  ;;  %v5059_v38 = vrot.slane %v5038_v23, 10  ;;  %v5910_v19 = vld [vmem:[%s6007_s30 + $0xb8] sm:$0xf] }
 0x103   : > { %v3866_v46 = vsel %vm6214_vm6, %v3864_v25, %v3865_v5  ;;  %v5039_v5 = vld [vmem:[%s6007_s30 + $0xbc] sm:$0x3]  ;;  %v4737_v56 = vrot.slane %v4715_v27, 9  ;;  %v3904_v34 = vrot.slane %v6826_v49, 6  ;;  %v5912_v49 = vld [vmem:[%s6007_s30 + $0xd0] sm:$0xf] }
 0x104   : > { %v3886_v62 = vrot.slane %v5039_v5, 6  ;;  %v4723_v5 = vld [vmem:[%s6007_s30 + $0xd4] sm:$0x1] }
 0x105   : > { %5378 = vmatmul.mubr.msk.bf16.gmra.mrb[20].mxu1 %vm585_vm4, %v5895_v30  ;;  %v2075_v30 = vrot.slane %v5907_v1, 5  ;;  %v2092_v1 = vrot.slane %v4714_v16, 5 }
 0x106   : > { %5381 = vmatprep.mubr.msk.bf16.mxu1 %vm585_vm4, %v5896_v42  ;;  %v4706_v42 = vld [vmem:[%s6007_s30 + $0x90] sm:$0xe] }
 0x107   : > { %v4734_v47 = vrot.slane %v4706_v42, 9  ;;  %v2077_v53 = vrot.slane %v2075_v30, 4 }
 0x108   : > { %5532 = vmatmul.mubr.msk.bf16.gmra.mrb[4].mxu0 %vm585_vm4, %v5068_v61  ;;  %v3863_v61 = vsel %vm6214_vm6, %v5056_v10, %v3862_v13  ;;  %v2089_v13 = vrot.slane %v5909_v9, 5  ;;  %v3883_v10 = vrot.slane %v6796_v43, 6  ;;  %v5074_v43 = vcombine.low %v3870_v15, %v3873_v7 }
 0x109   : > { %5535 = vmatprep.mubr.msk.bf16.mxu0 %vm585_vm4, %v5069_v45  ;;  %v5036_v45 = vld [vmem:[%s6007_s30 + $0xa8] sm:$0xc]  ;;  %v5073_v17 = vcombine.low %v3863_v61, %v3866_v46  ;;  %v2076_v50 = vsel %vm6009_vm3, %v4734_v47, %v2075_v30  ;;  %v2079_v59 = vsel %vm6009_vm3, %v2077_v53, %v2078_v41  ;;  %v5041_v30 = vld [vmem:[%s6007_s30 + $0xc8] sm:$0x3]  ;;  %v5911_v47 = vld [vmem:[%s6007_s30 + $0xc4] sm:$0xf] }
 0x10a   : > { %v5058_v22 = vrot.slane %v5036_v45, 10  ;;  %v2091_v36 = vrot.slane %v2089_v13, 4  ;;  %v3885_v42 = vrot.slane %v3883_v10, 4  ;;  %v3893_v21 = vrot.slane %v5041_v30, 6  ;;  %v4717_v45 = vld [vmem:[%s6007_s30 + $0xbc] sm:$0x1] }
 0x10b   : > { %v2090_v61 = vsel %vm6009_vm3, %v4736_v18, %v2089_v13  ;;  %v2103_v53 = vrot.slane %v5911_v47, 5  ;;  %v3884_v4 = vsel %vm6214_vm6, %v5059_v38, %v3883_v10  ;;  %v3899_v15 = vrot.slane %v3897_v12, 4 }
 0x10c   : > { %v3877_v25 = vsel %vm6214_vm6, %v5058_v22, %v3876_v3  ;;  %v2093_v46 = vsel %vm6009_vm3, %v2091_v36, %v2092_v1  ;;  %v4718_v3 = vld [vmem:[%s6007_s30 + $0xc0] sm:$0xe]  ;;  %v3887_v11 = vsel %vm6214_vm6, %v3885_v42, %v3886_v62  ;;  %v5043_v22 = vld [vmem:[%s6007_s30 + $0xd4] sm:$0x3]  ;;  %v2113_v30 = vrot.slane %v4723_v5, 5 }
 0x10d   : > { %5382 = vmatmul.mubr.msk.bf16.gmra.mrb[24].mxu1 %vm585_vm4, %v5897_v29  ;;  %v4709_v29 = vld [vmem:[%s6007_s30 + $0x9c] sm:$0xe]  ;;  %v5075_v60 = vcombine.low %v3877_v25, %v3880_v52  ;;  %v4753_v58 = vcombine.low %v2090_v61, %v2093_v46  ;;  %v4738_v2 = vrot.slane %v4718_v3, 9  ;;  %v5076_v9 = vcombine.low %v3884_v4, %v3887_v11  ;;  %v5047_v42 = vld [vmem:[%s6007_s30 + $0xec] sm:$0x3] }
 0x10e   : > { %5385 = vmatprep.mubr.msk.bf16.mxu1 %vm585_vm4, %v5898_v8  ;;  %v4711_v8 = vld [vmem:[%s6007_s30 + $0xa4] sm:$0x1]  ;;  %v4735_v0 = vrot.slane %v4709_v29, 9  ;;  %v3894_v29 = vsel %vm6214_vm6, %v3892_v44, %v3893_v21  ;;  %v3907_v25 = vrot.slane %v5045_v55, 6  ;;  %v3914_v27 = vrot.slane %v5047_v42, 6 }
 0x10f   : > { %v2085_v35 = vrot.slane %v4711_v8, 5  ;;  %v2105_v8 = vrot.slane %v2103_v53, 4  ;;  %v2104_v23 = vsel %vm6009_vm3, %v4738_v2, %v2103_v53 }
 0x110   : > { %5536 = vmatmul.mubr.msk.bf16.gmra.mrb[8].mxu0 %vm585_vm4, %v5070_v20  ;;  %v2084_v20 = vrot.slane %v2082_v14, 4  ;;  %v2083_v54 = vsel %vm6009_vm3, %v4735_v0, %v2082_v14  ;;  %v2099_v14 = vrot.slane %v4717_v45, 5  ;;  %v3900_v0 = vrot.slane %v5043_v22, 6 }
 0x111   : > { %5539 = vmatprep.mubr.msk.bf16.mxu0 %vm585_vm4, %v5071_v24  ;;  %v4751_v24 = vcombine.low %v2076_v50, %v2079_v59  ;;  %v5044_v59 = vld [vmem:[%s6007_s30 + $0xd8] sm:$0xc] }
 0x112   : > { %v2086_v31 = vsel %vm6009_vm3, %v2084_v20, %v2085_v35  ;;  %v5062_v7 = vrot.slane %v5044_v59, 10  ;;  %v4721_v20 = vld [vmem:[%s6007_s30 + $0xcc] sm:$0xe]  ;;  %v2110_v35 = vrot.slane %v5912_v49, 5  ;;  %v3901_v52 = vsel %vm6214_vm6, %v3899_v15, %v3900_v0 }
 0x113   : > { %v4752_v41 = vcombine.low %v2083_v54, %v2086_v31  ;;  %v4739_v18 = vrot.slane %v4721_v20, 9  ;;  %v3911_v54 = vrot.slane %v6849_v48, 6 }
 0x114   : > { %v2112_v1 = vrot.slane %v2110_v35, 4  ;;  %v3905_v38 = vsel %vm6214_vm6, %v5062_v7, %v3904_v34 }
 0x115   : > { %5386 = vmatmul.mubr.msk.bf16.gmra.mrb[28].mxu1 %vm585_vm4, %v5899_v51  ;;  %v5060_v51 = vrot.slane %v5040_v28, 10  ;;  %v3913_v21 = vrot.slane %v3911_v54, 4 }
 0x116   : > { %5407 = vmatprep.mubr.msk.bf16.mxu1 %vm585_vm4, %v4749_v63  ;;  %v2096_v63 = vrot.slane %v5910_v19, 5  ;;  %v2114_v48 = vsel %vm6009_vm3, %v2112_v1, %v2113_v30 }
 0x117   : > { %v3891_v57 = vsel %vm6214_vm6, %v5060_v51, %v3890_v32  ;;  %v2111_v51 = vsel %vm6009_vm3, %v4739_v18, %v2110_v35  ;;  %v3915_v61 = vsel %vm6214_vm6, %v3913_v21, %v3914_v27 }
 0x118   : > { %5540 = vmatmul.mubr.msk.bf16.gmra.mrb[12].mxu0 %vm585_vm4, %v5072_v40  ;;  %v4720_v40 = vld [vmem:[%s6007_s30 + $0xc8] sm:$0x1]  ;;  %v2098_v39 = vrot.slane %v2096_v63, 4  ;;  %v2097_v13 = vsel %vm6009_vm3, %v4737_v56, %v2096_v63  ;;  %v5077_v33 = vcombine.low %v3891_v57, %v3894_v29  ;;  %v4756_v19 = vcombine.low %v2111_v51, %v2114_v48 }
 0x119   : > { %5543 = vmatprep.mubr.msk.bf16.mxu0 %vm585_vm4, %v5073_v17  ;;  %v5042_v17 = vld [vmem:[%s6007_s30 + $0xcc] sm:$0xc]  ;;  %v2106_v50 = vrot.slane %v4720_v40, 5 }
 0x11a   : > { %v2100_v16 = vsel %vm6009_vm3, %v2098_v39, %v2099_v14  ;;  %v7103_v14 = vld [vmem:[%s7261_s2] ss:$0 sm:$0xff] }
 0x11b   : > { %v2107_v10 = vsel %vm6009_vm3, %v2105_v8, %v2106_v50  ;;  %v4754_v28 = vcombine.low %v2097_v13, %v2100_v16  ;;  %v7108_v8 = vld [vmem:[%s7262_s3] ss:$0 sm:$0xff] }
 0x11c   : > { %v4755_v36 = vcombine.low %v2104_v23, %v2107_v10 }
 0x11d   : > { %5408 = vmatmul.mubr.msk.bf16.vlgmr.msra.gmra.mrb[16].mxu1 %vm585_vm4, %v4750_v37  ;;  %v5061_v37 = vrot.slane %v5042_v17, 10 }
 0x11e   : > { %5411 = vmatprep.mubr.msk.bf16.mxu1 %vm585_vm4, %v4751_v24  ;;  %v3906_v24 = vrot.slane %v3904_v34, 4 }
 0x11f   : > { %v3898_v32 = vsel %vm6214_vm6, %v5061_v37, %v3897_v12 }
 0x120   : > { %5544 = vmatmul.mubr.msk.bf16.gmra.mrb[16].mxu0 %vm585_vm4, %v5074_v43  ;;  %v5046_v43 = vld [vmem:[%s6007_s30 + $0xe4] sm:$0xc]  ;;  %v3908_v31 = vsel %vm6214_vm6, %v3906_v24, %v3907_v25  ;;  %v5078_v62 = vcombine.low %v3898_v32, %v3901_v52 }
 0x121   : > { %5547 = vmatprep.mubr.msk.bf16.mxu0 %vm585_vm4, %v5075_v60  ;;  %v5063_v60 = vrot.slane %v5046_v43, 10  ;;  %v5079_v44 = vcombine.low %v3905_v38, %v3908_v31 }
 0x123   : > { %v3912_v63 = vsel %vm6214_vm6, %v5063_v60, %v3911_v54 }
 0x124   : > { %v5080_v46 = vcombine.low %v3912_v63, %v3915_v61 }
 0x125   : > { %5412 = vmatmul.mubr.msk.bf16.gmra.mrb[20].mxu1 %vm585_vm4, %v4752_v41 }
 0x126   : > { %5415 = vmatprep.mubr.msk.bf16.mxu1 %vm585_vm4, %v4753_v58 }
 0x128   : > { %5548 = vmatmul.mubr.msk.bf16.gmra.mrb[20].mxu0 %vm585_vm4, %v5076_v9 }
 0x129   : > { %5551 = vmatprep.mubr.msk.bf16.mxu0 %vm585_vm4, %v5077_v33 }
 0x12d   : > { %5416 = vmatmul.mubr.msk.bf16.gmra.mrb[24].mxu1 %vm585_vm4, %v4754_v28 }
 0x12e   : > { %5419 = vmatprep.mubr.msk.bf16.mxu1 %vm585_vm4, %v4755_v36 }
 0x130   : > { %5552 = vmatmul.mubr.msk.bf16.gmra.mrb[24].mxu0 %vm585_vm4, %v5078_v62 }
 0x131   : > { %5555 = vmatprep.mubr.msk.bf16.mxu0 %vm585_vm4, %v5079_v44 }
 0x135   : > { %5420 = vmatmul.mubr.msk.bf16.gmra.mrb[28].mxu1 %vm585_vm4, %v4756_v19 }
 0x138   : > { %5556 = vmatmul.mubr.msk.bf16.gmra.mrb[28].mxu0 %vm585_vm4, %v5080_v46 }
 0x1b0   : > { %v5359_v6 = vpop.f32.mrb[0].mxu1 }
 0x1b1   : > { %v1748_v45 = vpop.f32.mrb[1].mxu1 }
 0x1b2   : > { %v5360_v47 = vpop.f32.mrb[2].mxu1 }
 0x1b3   : > { %v1751_v53 = vpop.f32.mrb[3].mxu1 }
 0x1b8   : > { %v5363_v41 = vpop.f32.mrb[4].mxu1 }
 0x1b9   : > { %v1764_v4 = vpop.f32.mrb[5].mxu1 }
 0x1ba   : > { %v5364_v3 = vpop.f32.mrb[6].mxu1 }
 0x1bb   : > { %v1767_v40 = vpop.f32.mrb[7].mxu1 }
 0x1c0   : > { %v5367_v11 = vpop.f32.mrb[8].mxu1 }
 0x1c1   : > { %v1780_v57 = vpop.f32.mrb[9].mxu1 }
 0x1c2   : > { %v7088_v56 = vpop.f32.mrb[10].mxu1 }
 0x1c3   : > { %v7090_v26 = vpop.f32.mrb[11].mxu1 }
 0x1c8   : > { %v7092_v12 = vpop.f32.mrb[12].mxu1 }
 0x1c9   : > { %v7094_v58 = vpop.f32.mrb[13].mxu1 }
 0x1ca   : > { %v7096_v29 = vpop.f32.mrb[14].mxu1 }
 0x1cb   : > { %v7098_v39 = vpop.f32.mrb[15].mxu1 }
 0x1d3   : > { %v5529_v17 = vpop.f32.mrb[0].mxu0 }
 0x1d4   : > { %v5561_v22 = vadd.f32 %v5529_v17, %v5359_v6  ;;  %v4051_v2 = vpop.f32.mrb[1].mxu0 }
 0x1d5   : > { %v5562_v50 = vadd.f32 %v4051_v2, %v1748_v45  ;;  %v5530_v59 = vpop.f32.mrb[2].mxu0 }
 0x1d6   : > { %v4212_v34 = vmul.f32 %v5561_v22, %v7103_v14  ;;  %v5563_v9 = vadd.f32 %v5530_v59, %v5360_v47  ;;  %v4054_v55 = vpop.f32.mrb[3].mxu0 }
 0x1d7   : > { %v4210_v13 = vmul.f32 %v5562_v50, %v7103_v14  ;;  %v5564_v37 = vadd.f32 %v4054_v55, %v1751_v53 }
 0x1d8   : > { %v4244_v15 = vadd.f32 %v7108_v8, %v4212_v34  ;;  %v4213_v0 = vmul.f32 %v5563_v9, %v7103_v14 }
 0x1d9   : > { %v4242_v33 = vadd.f32 %v7108_v8, %v4210_v13  ;;  %v4211_v16 = vmul.f32 %v5564_v37, %v7103_v14 }
 0x1da   : > { %v4276_v7 = vmax.f32 %v4244_v15, 0.0  ;;  %v4245_v20 = vadd.f32 %v7108_v8, %v4213_v0 }
 0x1db   : > { %v4274_v49 = vmax.f32 %v4242_v33, 0.0  ;;  %v4243_v35 = vadd.f32 %v7108_v8, %v4211_v16  ;;  %v5533_v23 = vpop.f32.mrb[4].mxu0 }
 0x1dc   : > { %4309 = vst.msk [vmem:[%s7118_s28 + $0x10] sm:$0xff] %vm4306_vm7, %v4276_v7  ;;  %v4277_v10 = vmax.f32 %v4245_v20, 0.0  ;;  %v5565_v24 = vadd.f32 %v5533_v23, %v5363_v41  ;;  %v4067_v25 = vpop.f32.mrb[5].mxu0 }
 0x1dd   : > { %4307 = vst.msk [vmem:[%s7118_s28] sm:$0xff] %vm4306_vm7, %v4274_v49  ;;  %v4275_v5 = vmax.f32 %v4243_v35, 0.0  ;;  %v5566_v28 = vadd.f32 %v4067_v25, %v1764_v4  ;;  %v5534_v32 = vpop.f32.mrb[6].mxu0 }
 0x1de   : > { %4310 = vst.msk [vmem:[%s7118_s28 + $0x18] sm:$0xff] %vm4306_vm7, %v4277_v10  ;;  %v4216_v52 = vmul.f32 %v5565_v24, %v7103_v14  ;;  %v5567_v18 = vadd.f32 %v5534_v32, %v5364_v3  ;;  %v4070_v36 = vpop.f32.mrb[7].mxu0 }
 0x1df   : > { %4308 = vst.msk [vmem:[%s7118_s28 + $0x8] sm:$0xff] %vm4306_vm7, %v4275_v5  ;;  %v4214_v1 = vmul.f32 %v5566_v28, %v7103_v14  ;;  %v5568_v30 = vadd.f32 %v4070_v36, %v1767_v40 }
 0x1e0   : > { %v4248_v43 = vadd.f32 %v7108_v8, %v4216_v52  ;;  %v4217_v54 = vmul.f32 %v5567_v18, %v7103_v14 }
 0x1e1   : > { %v4246_v38 = vadd.f32 %v7108_v8, %v4214_v1  ;;  %v4215_v31 = vmul.f32 %v5568_v30, %v7103_v14 }
 0x1e2   : > { %v4280_v42 = vmax.f32 %v4248_v43, 0.0  ;;  %v4249_v62 = vadd.f32 %v7108_v8, %v4217_v54 }
 0x1e3   : > { %v4278_v51 = vmax.f32 %v4246_v38, 0.0  ;;  %v4247_v60 = vadd.f32 %v7108_v8, %v4215_v31  ;;  %v5537_v44 = vpop.f32.mrb[8].mxu0 }
 0x1e4   : > { %4313 = vst.msk [vmem:[%s7118_s28 + $0x30] sm:$0xff] %vm4306_vm7, %v4280_v42  ;;  %v4281_v48 = vmax.f32 %v4249_v62, 0.0  ;;  %v5569_v21 = vadd.f32 %v5537_v44, %v5367_v11  ;;  %v4083_v27 = vpop.f32.mrb[9].mxu0 }
 0x1e5   : > { %4311 = vst.msk [vmem:[%s7118_s28 + $0x20] sm:$0xff] %vm4306_vm7, %v4278_v51  ;;  %v4279_v19 = vmax.f32 %v4247_v60, 0.0  ;;  %v5570_v63 = vadd.f32 %v4083_v27, %v1780_v57  ;;  %v5538_v61 = vpop.f32.mrb[10].mxu0 }
 0x1e6   : > { %4314 = vst.msk [vmem:[%s7118_s28 + $0x38] sm:$0xff] %vm4306_vm7, %v4281_v48  ;;  %v4220_v46 = vmul.f32 %v5569_v21, %v7103_v14  ;;  %v5571_v6 = vadd.f32 %v5538_v61, %v7088_v56  ;;  %v4086_v45 = vpop.f32.mrb[11].mxu0 }
 0x1e7   : > { %4312 = vst.msk [vmem:[%s7118_s28 + $0x28] sm:$0xff] %vm4306_vm7, %v4279_v19  ;;  %v4218_v47 = vmul.f32 %v5570_v63, %v7103_v14  ;;  %v5572_v53 = vadd.f32 %v4086_v45, %v7090_v26 }
 0x1e8   : > { %v4252_v41 = vadd.f32 %v7108_v8, %v4220_v46  ;;  %v4221_v4 = vmul.f32 %v5571_v6, %v7103_v14 }
 0x1e9   : > { %v4250_v3 = vadd.f32 %v7108_v8, %v4218_v47  ;;  %v4219_v40 = vmul.f32 %v5572_v53, %v7103_v14 }
 0x1ea   : > { %v4284_v11 = vmax.f32 %v4252_v41, 0.0  ;;  %v4253_v57 = vadd.f32 %v7108_v8, %v4221_v4 }
 0x1eb   : > { %v4282_v56 = vmax.f32 %v4250_v3, 0.0  ;;  %v4251_v17 = vadd.f32 %v7108_v8, %v4219_v40  ;;  %v5541_v22 = vpop.f32.mrb[12].mxu0 }
 0x1ec   : > { %4317 = vst.msk [vmem:[%s7118_s28 + $0x50] sm:$0xff] %vm4306_vm7, %v4284_v11  ;;  %v4285_v26 = vmax.f32 %v4253_v57, 0.0  ;;  %v5573_v2 = vadd.f32 %v5541_v22, %v7092_v12  ;;  %v4099_v50 = vpop.f32.mrb[13].mxu0 }
 0x1ed   : > { %4315 = vst.msk [vmem:[%s7118_s28 + $0x40] sm:$0xff] %vm4306_vm7, %v4282_v56  ;;  %v4283_v59 = vmax.f32 %v4251_v17, 0.0  ;;  %v5574_v34 = vadd.f32 %v4099_v50, %v7094_v58  ;;  %v5542_v9 = vpop.f32.mrb[14].mxu0 }
 0x1ee   : > { %4318 = vst.msk [vmem:[%s7118_s28 + $0x58] sm:$0xff] %vm4306_vm7, %v4285_v26  ;;  %v4224_v55 = vmul.f32 %v5573_v2, %v7103_v14  ;;  %v5575_v13 = vadd.f32 %v5542_v9, %v7096_v29  ;;  %v4102_v37 = vpop.f32.mrb[15].mxu0 }
 0x1ef   : > { %4316 = vst.msk [vmem:[%s7118_s28 + $0x48] sm:$0xff] %vm4306_vm7, %v4283_v59  ;;  %v4222_v15 = vmul.f32 %v5574_v34, %v7103_v14  ;;  %v5576_v12 = vadd.f32 %v4102_v37, %v7098_v39 }
 0x1f0   : > { %v5409_v0 = vpop.f32.mrb[16].mxu1  ;;  %v4256_v33 = vadd.f32 %v7108_v8, %v4224_v55  ;;  %v4225_v58 = vmul.f32 %v5575_v13, %v7103_v14 }
 0x1f1   : > { %v2314_v16 = vpop.f32.mrb[17].mxu1  ;;  %v4254_v7 = vadd.f32 %v7108_v8, %v4222_v15  ;;  %v4223_v20 = vmul.f32 %v5576_v12, %v7103_v14 }
 0x1f2   : > { %v5410_v29 = vpop.f32.mrb[18].mxu1  ;;  %v4288_v49 = vmax.f32 %v4256_v33, 0.0  ;;  %v4257_v35 = vadd.f32 %v7108_v8, %v4225_v58 }
 0x1f3   : > { %v2317_v23 = vpop.f32.mrb[19].mxu1  ;;  %v4286_v10 = vmax.f32 %v4254_v7, 0.0  ;;  %v4255_v39 = vadd.f32 %v7108_v8, %v4223_v20  ;;  %v5545_v24 = vpop.f32.mrb[16].mxu0 }
 0x1f4   : > { %4321 = vst.msk [vmem:[%s7118_s28 + $0x70] sm:$0xff] %vm4306_vm7, %v4288_v49  ;;  %v4289_v25 = vmax.f32 %v4257_v35, 0.0  ;;  %v5577_v5 = vadd.f32 %v5545_v24, %v5409_v0  ;;  %v4115_v28 = vpop.f32.mrb[17].mxu0 }
 0x1f5   : > { %4319 = vst.msk [vmem:[%s7118_s28 + $0x60] sm:$0xff] %vm4306_vm7, %v4286_v10  ;;  %v4287_v32 = vmax.f32 %v4255_v39, 0.0  ;;  %v5578_v52 = vadd.f32 %v4115_v28, %v2314_v16  ;;  %v5546_v18 = vpop.f32.mrb[18].mxu0 }
 0x1f6   : > { %4322 = vst.msk [vmem:[%s7118_s28 + $0x78] sm:$0xff] %vm4306_vm7, %v4289_v25  ;;  %v4228_v36 = vmul.f32 %v5577_v5, %v7103_v14  ;;  %v5579_v1 = vadd.f32 %v5546_v18, %v5410_v29  ;;  %v4118_v30 = vpop.f32.mrb[19].mxu0 }
 0x1f7   : > { %4320 = vst.msk [vmem:[%s7118_s28 + $0x68] sm:$0xff] %vm4306_vm7, %v4287_v32  ;;  %v4226_v43 = vmul.f32 %v5578_v52, %v7103_v14  ;;  %v5580_v54 = vadd.f32 %v4118_v30, %v2317_v23 }
 0x1f8   : > { %v5413_v38 = vpop.f32.mrb[20].mxu1  ;;  %v4260_v31 = vadd.f32 %v7108_v8, %v4228_v36  ;;  %v4229_v42 = vmul.f32 %v5579_v1, %v7103_v14 }
 0x1f9   : > { %v2330_v62 = vpop.f32.mrb[21].mxu1  ;;  %v4258_v51 = vadd.f32 %v7108_v8, %v4226_v43  ;;  %v4227_v60 = vmul.f32 %v5580_v54, %v7103_v14 }
 0x1fa   : > { %v5414_v44 = vpop.f32.mrb[22].mxu1  ;;  %v4292_v48 = vmax.f32 %v4260_v31, 0.0  ;;  %v4261_v21 = vadd.f32 %v7108_v8, %v4229_v42 }
 0x1fb   : > { %v2333_v27 = vpop.f32.mrb[23].mxu1  ;;  %v4290_v19 = vmax.f32 %v4258_v51, 0.0  ;;  %v4259_v63 = vadd.f32 %v7108_v8, %v4227_v60  ;;  %v5549_v61 = vpop.f32.mrb[20].mxu0 }
 0x1fc   : > { %4325 = vst.msk [vmem:[%s7118_s28 + $0x90] sm:$0xff] %vm4306_vm7, %v4292_v48  ;;  %v4293_v46 = vmax.f32 %v4261_v21, 0.0  ;;  %v5581_v6 = vadd.f32 %v5549_v61, %v5413_v38  ;;  %v4131_v45 = vpop.f32.mrb[21].mxu0 }
 0x1fd   : > { %4323 = vst.msk [vmem:[%s7118_s28 + $0x80] sm:$0xff] %vm4306_vm7, %v4290_v19  ;;  %v4291_v47 = vmax.f32 %v4259_v63, 0.0  ;;  %v5582_v53 = vadd.f32 %v4131_v45, %v2330_v62  ;;  %v5550_v41 = vpop.f32.mrb[22].mxu0 }
 0x1fe   : > { %4326 = vst.msk [vmem:[%s7118_s28 + $0x98] sm:$0xff] %vm4306_vm7, %v4293_v46  ;;  %v4232_v4 = vmul.f32 %v5581_v6, %v7103_v14  ;;  %v5583_v3 = vadd.f32 %v5550_v41, %v5414_v44  ;;  %v4134_v40 = vpop.f32.mrb[23].mxu0 }
 0x1ff   : > { %4324 = vst.msk [vmem:[%s7118_s28 + $0x88] sm:$0xff] %vm4306_vm7, %v4291_v47  ;;  %v4230_v11 = vmul.f32 %v5582_v53, %v7103_v14  ;;  %v5584_v57 = vadd.f32 %v4134_v40, %v2333_v27 }
 0x200   : > { %v5417_v56 = vpop.f32.mrb[24].mxu1  ;;  %v4264_v17 = vadd.f32 %v7108_v8, %v4232_v4  ;;  %v4233_v22 = vmul.f32 %v5583_v3, %v7103_v14 }
 0x201   : > { %v2346_v26 = vpop.f32.mrb[25].mxu1  ;;  %v4262_v2 = vadd.f32 %v7108_v8, %v4230_v11  ;;  %v4231_v50 = vmul.f32 %v5584_v57, %v7103_v14 }
 0x202   : > { %v5418_v59 = vpop.f32.mrb[26].mxu1  ;;  %v4296_v34 = vmax.f32 %v4264_v17, 0.0  ;;  %v4265_v9 = vadd.f32 %v7108_v8, %v4233_v22 }
 0x203   : > { %v2349_v55 = vpop.f32.mrb[27].mxu1  ;;  %v4294_v13 = vmax.f32 %v4262_v2, 0.0  ;;  %v4263_v37 = vadd.f32 %v7108_v8, %v4231_v50  ;;  %v5553_v15 = vpop.f32.mrb[24].mxu0 }
 0x204   : > { %4329 = vst.msk [vmem:[%s7118_s28 + $0xb0] sm:$0xff] %vm4306_vm7, %v4296_v34  ;;  %v4297_v12 = vmax.f32 %v4265_v9, 0.0  ;;  %v5585_v0 = vadd.f32 %v5553_v15, %v5417_v56  ;;  %v4147_v33 = vpop.f32.mrb[25].mxu0 }
 0x205   : > { %4327 = vst.msk [vmem:[%s7118_s28 + $0xa0] sm:$0xff] %vm4306_vm7, %v4294_v13  ;;  %v4295_v58 = vmax.f32 %v4263_v37, 0.0  ;;  %v5586_v16 = vadd.f32 %v4147_v33, %v2346_v26  ;;  %v5554_v7 = vpop.f32.mrb[26].mxu0 }
 0x206   : > { %4330 = vst.msk [vmem:[%s7118_s28 + $0xb8] sm:$0xff] %vm4306_vm7, %v4297_v12  ;;  %v4236_v20 = vmul.f32 %v5585_v0, %v7103_v14  ;;  %v5587_v29 = vadd.f32 %v5554_v7, %v5418_v59  ;;  %v4150_v49 = vpop.f32.mrb[27].mxu0 }
 0x207   : > { %4328 = vst.msk [vmem:[%s7118_s28 + $0xa8] sm:$0xff] %vm4306_vm7, %v4295_v58  ;;  %v4234_v35 = vmul.f32 %v5586_v16, %v7103_v14  ;;  %v5588_v23 = vadd.f32 %v4150_v49, %v2349_v55 }
 0x208   : > { %v5421_v10 = vpop.f32.mrb[28].mxu1  ;;  %v4268_v39 = vadd.f32 %v7108_v8, %v4236_v20  ;;  %v4237_v24 = vmul.f32 %v5587_v29, %v7103_v14 }
 0x209   : > { %v2362_v25 = vpop.f32.mrb[29].mxu1  ;;  %v4266_v5 = vadd.f32 %v7108_v8, %v4234_v35  ;;  %v4235_v28 = vmul.f32 %v5588_v23, %v7103_v14 }
 0x20a   : > { %v5422_v32 = vpop.f32.mrb[30].mxu1  ;;  %v4300_v52 = vmax.f32 %v4268_v39, 0.0  ;;  %v4269_v18 = vadd.f32 %v7108_v8, %v4237_v24 }
 0x20b   : > { %v2365_v36 = vpop.f32.mrb[31].mxu1  ;;  %v4298_v1 = vmax.f32 %v4266_v5, 0.0  ;;  %v4267_v30 = vadd.f32 %v7108_v8, %v4235_v28  ;;  %v5557_v43 = vpop.f32.mrb[28].mxu0 }
 0x20c   : > { %4333 = vst.msk [vmem:[%s7118_s28 + $0xd0] sm:$0xff] %vm4306_vm7, %v4300_v52  ;;  %v4301_v54 = vmax.f32 %v4269_v18, 0.0  ;;  %v5589_v38 = vadd.f32 %v5557_v43, %v5421_v10  ;;  %v4163_v31 = vpop.f32.mrb[29].mxu0 }
 0x20d   : > { %4331 = vst.msk [vmem:[%s7118_s28 + $0xc0] sm:$0xff] %vm4306_vm7, %v4298_v1  ;;  %v4299_v42 = vmax.f32 %v4267_v30, 0.0  ;;  %v5590_v62 = vadd.f32 %v4163_v31, %v2362_v25  ;;  %v5558_v51 = vpop.f32.mrb[30].mxu0 }
 0x20e   : > { %4334 = vst.msk [vmem:[%s7118_s28 + $0xd8] sm:$0xff] %vm4306_vm7, %v4301_v54  ;;  %v4240_v60 = vmul.f32 %v5589_v38, %v7103_v14  ;;  %v5591_v44 = vadd.f32 %v5558_v51, %v5422_v32  ;;  %v4166_v48 = vpop.f32.mrb[31].mxu0 }
 0x20f   : > { %4332 = vst.msk [vmem:[%s7118_s28 + $0xc8] sm:$0xff] %vm4306_vm7, %v4299_v42  ;;  %v4238_v21 = vmul.f32 %v5590_v62, %v7103_v14  ;;  %v5592_v27 = vadd.f32 %v4166_v48, %v2365_v36 }
 0x210   : > { %v4272_v19 = vadd.f32 %v7108_v8, %v4240_v60  ;;  %v4241_v63 = vmul.f32 %v5591_v44, %v7103_v14 }
 0x211   : > { %v4270_v61 = vadd.f32 %v7108_v8, %v4238_v21  ;;  %v4239_v46 = vmul.f32 %v5592_v27, %v7103_v14 }
 0x212   : > { %v4304_v6 = vmax.f32 %v4272_v19, 0.0  ;;  %v4273_v45 = vadd.f32 %v7108_v8, %v4241_v63 }
 0x213   : > { %v4302_v47 = vmax.f32 %v4270_v61, 0.0  ;;  %v4271_v53 = vadd.f32 %v7108_v8, %v4239_v46 }
 0x214   : > { %4337 = vst.msk [vmem:[%s7118_s28 + $0xf0] sm:$0xff] %vm4306_vm7, %v4304_v6  ;;  %v4305_v41 = vmax.f32 %v4273_v45, 0.0 }
 0x215   : > { %4335 = vst.msk [vmem:[%s7118_s28 + $0xe0] sm:$0xff] %vm4306_vm7, %v4302_v47  ;;  %v4303_v4 = vmax.f32 %v4271_v53, 0.0 }
 0x216   : > { %4338 = vst.msk [vmem:[%s7118_s28 + $0xf8] sm:$0xff] %vm4306_vm7, %v4305_v41 }
 0x217   : > { %4336 = vst.msk [vmem:[%s7118_s28 + $0xe8] sm:$0xff] %vm4306_vm7, %v4303_v4 }
 0x218 PF: > { %s14_s17 = sadd.s32 1, %s5935_s17   ;;  %s7268_s15 = smov %s5931_s16 }
 0x219   : > { %p11_p5 = scmp.ge.s32.totalorder %s14_s17, 4   ;;  %s7269_s16 = smov %s7271_s18 }
 0x21b   :  { %13 = sbr.rel (!%p11_p5) target bundleno = 2 (0x2), region = 85 }

</bundles_post_ra>
